<compile_context>
chip_gen: v6e
topology: v6e:2x2x1
jax: 0.10.0
libtpu: 0.0.40
codegen_flags: <defaults>
</compile_context>

<pallas_src>
import jax
import jax.numpy as jnp
from jax import lax
from jax.experimental import pallas as pl
from jax.experimental.pallas import tpu as pltpu
import numpy as np


def _make_double_conv_kernel(H, W, Cin, Cmid, Cout, nb):
    R = nb * (H + 2)   # stacked padded rows handled per grid step
    M = R - 2          # matmul M dimension

    def kernel(x_ref, bw1_ref, b1_ref, bw2_ref, b2_ref, out_ref,
               xpad_ref, midpad_ref):
        # x_ref    : (nb, H, W*Cin)          input slab group (matmul dtype)
        # bw1_ref  : (3, W*Cin,  W*Cmid)     banded conv1 weights (per dy)
        # b1_ref   : (1, W*Cmid)             conv1 bias, lane-tiled (f32)
        # bw2_ref  : (3, W*Cmid, W*Cout)     banded conv2 weights (per dy)
        # b2_ref   : (1, W*Cout)             conv2 bias, lane-tiled (f32)
        # out_ref  : (nb, H, W*Cout)
        # xpad_ref : VMEM (nb*(H+2), W*Cin)  row-stacked, vertically padded input
        # midpad_ref: VMEM (nb*(H+2), W*Cmid) same layout for the intermediate

        # Zero the vertical halo rows and stage the inputs.  Every scratch row
        # read below is rewritten here, every step: no dependence on scratch
        # persistence across (possibly core-sharded) grid steps.
        for g in range(nb):
            top = g * (H + 2)
            xpad_ref[pl.ds(top, 1), :] = jnp.zeros((1, W * Cin), xpad_ref.dtype)
            xpad_ref[pl.ds(top + H + 1, 1), :] = jnp.zeros((1, W * Cin),
                                                           xpad_ref.dtype)
            midpad_ref[pl.ds(top, 1), :] = jnp.zeros((1, W * Cmid),
                                                     midpad_ref.dtype)
            midpad_ref[pl.ds(top + H + 1, 1), :] = jnp.zeros((1, W * Cmid),
                                                             midpad_ref.dtype)
            # dx padding lives in the banded weights -> this is a full-width,
            # lane-aligned store (no 128-lane tile crossing).
            xpad_ref[pl.ds(top + 1, H), :] = x_ref[g]

        # ---- conv1 + bias + ReLU: 3 banded MXU matmuls, K = W*Cin ----
        acc1 = jnp.zeros((M, W * Cmid), jnp.float32)
        for dy in range(3):                                  # unrolled, static
            acc1 += jnp.dot(xpad_ref[pl.ds(dy, M), :], bw1_ref[dy],
                            preferred_element_type=jnp.float32)
        act1 = jnp.maximum(acc1 + b1_ref[...], 0.0)

        # Stage the intermediate per image into midpad's interior.  Rows of
        # act1 that land on halo positions (between images) are simply never
        # stored; the halo rows were zeroed above.
        for g in range(nb):
            top = g * (H + 2)
            midpad_ref[pl.ds(top + 1, H), :] = (
                act1[top:top + H].astype(midpad_ref.dtype))

        # ---- conv2 + bias + ReLU: 3 banded MXU matmuls, K = W*Cmid ----
        acc2 = jnp.zeros((M, W * Cout), jnp.float32)
        for dy in range(3):
            acc2 += jnp.dot(midpad_ref[pl.ds(dy, M), :], bw2_ref[dy],
                            preferred_element_type=jnp.float32)
        act2 = jnp.maximum(acc2 + b2_ref[...], 0.0)
        for g in range(nb):
            top = g * (H + 2)
            out_ref[g] = act2[top:top + H].astype(out_ref.dtype)

    return kernel


def _band_placement(W):
    """ind[dx, wi, wo] = 1 iff input column wi == wo + dx - 1 (valid taps only).

    Out-of-range taps (wo=0,dx=0) / (wo=W-1,dx=2) are dropped, which IS the
    horizontal zero-padding -- no physical W+2 padding anywhere.
    """
    ind = np.zeros((3, W, W), np.float32)
    for dx in range(3):
        for wo in range(W):
            wi = wo + dx - 1
            if 0 <= wi < W:
                ind[dx, wi, wo] = 1.0
    return jnp.asarray(ind)


def _pack_banded(weight_oihw, W, dtype):
    """(Cout, Cin, 3, 3) OIHW -> (3, W*Cin, W*Cout) banded matrices.

    bw[dy, wi*Cin + c, wo*Cout + o] = weight[o, c, dy, dx] where wi = wo+dx-1.
    """
    wt = jnp.transpose(weight_oihw, (2, 3, 1, 0))        # (ky, kx, Cin, Cout)
    ind = _band_placement(W)                             # (kx, W_in, W_out)
    bw = jnp.einsum('xiw,yxco->yicwo', ind, wt)          # (ky, W_in, Cin, W_out, Cout)
    Cout, Cin = weight_oihw.shape[0], weight_oihw.shape[1]
    return bw.reshape(3, W * Cin, W * Cout).astype(dtype)


def _pick_group_size(N, H, max_rows=512, min_rows_per_core=64):
    """Images stacked per grid step: as many as possible (large MXU M, few
    ~0.35us grid steps) subject to a per-step row cap, but keep >=2 grid steps
    (v7x megacore) once each step would still carry a decent number of rows."""
    rows_per_img = H + 2
    nb = max(1, min(N, max_rows // rows_per_img))
    if N > 1 and (N - N // 2) * rows_per_img >= min_rows_per_core:
        nb = min(nb, (N + 1) // 2)
    while N % nb:          # round down to a divisor of N so blocks tile evenly
        nb -= 1
    return nb


def double_conv(x_nchw, w1, b1, w2, b2, *, matmul_dtype=jnp.bfloat16,
                group_size=None, single_buffer_weights=True):
    """Forward pass of DoubleConv.

    x_nchw: (N, Cin, H, W)  -- PyTorch NCHW layout
    w1    : (Cmid, Cin, 3, 3), b1: (Cmid,)
    w2    : (Cout, Cmid, 3, 3), b2: (Cout,)
    returns (N, Cout, H, W)
    """
    N, Cin, H, W = x_nchw.shape
    Cmid = w1.shape[0]
    Cout = w2.shape[0]

    nb = group_size if group_size is not None else _pick_group_size(N, H)
    assert N % nb == 0
    num_groups = N // nb
    R = nb * (H + 2)

    # Layout glue only (no HBM-side spatial padding): NCHW -> (N, H, W*Cin).
    x_slab = (jnp.transpose(x_nchw, (0, 2, 3, 1))
              .reshape(N, H, W * Cin).astype(matmul_dtype))

    bw1 = _pack_banded(w1, W, matmul_dtype)              # (3, W*Cin,  W*Cmid)
    bw2 = _pack_banded(w2, W, matmul_dtype)              # (3, W*Cmid, W*Cout)
    b1t = jnp.tile(b1.astype(jnp.float32), W).reshape(1, W * Cmid)
    b2t = jnp.tile(b2.astype(jnp.float32), W).reshape(1, W * Cout)

    kernel = _make_double_conv_kernel(H, W, Cin, Cmid, Cout, nb)

    def build(single_buf):
        wkw = dict(pipeline_mode=pl.Buffered(1)) if single_buf else {}
        return pl.pallas_call(
            kernel,
            out_shape=jax.ShapeDtypeStruct((N, H, W * Cout), x_nchw.dtype),
            grid_spec=pltpu.PrefetchScalarGridSpec(
                num_scalar_prefetch=0,
                grid=(num_groups,),
                in_specs=[
                    pl.BlockSpec((nb, H, W * Cin), lambda i: (i, 0, 0)),
                    pl.BlockSpec((3, W * Cin, W * Cmid),
                                 lambda i: (0, 0, 0), **wkw),
                    pl.BlockSpec((1, W * Cmid), lambda i: (0, 0), **wkw),
                    pl.BlockSpec((3, W * Cmid, W * Cout),
                                 lambda i: (0, 0, 0), **wkw),
                    pl.BlockSpec((1, W * Cout), lambda i: (0, 0), **wkw),
                ],
                out_specs=pl.BlockSpec((nb, H, W * Cout), lambda i: (i, 0, 0)),
                scratch_shapes=[
                    pltpu.VMEM((R, W * Cin), matmul_dtype),
                    pltpu.VMEM((R, W * Cmid), matmul_dtype),
                ],
            ),
            compiler_params=pltpu.CompilerParams(
                dimension_semantics=("parallel",)),
        )

    try:
        out_slab = build(single_buffer_weights)(x_slab, bw1, b1t, bw2, b2t)
    except Exception:
        if not single_buffer_weights:
            raise
        # Fallback if this JAX build rejects Buffered(1) single-buffering.
        out_slab = build(False)(x_slab, bw1, b1t, bw2, b2t)

    out_nhwc = out_slab.reshape(N, H, W, Cout)
    return jnp.transpose(out_nhwc, (0, 3, 1, 2))


def _ref_double_conv(x, w1, b1, w2, b2):
    """Pure-JAX f32 reference matching the PyTorch module semantics (NCHW)."""
    dn = ('NCHW', 'OIHW', 'NCHW')
    y = lax.conv_general_dilated(x, w1, (1, 1), ((1, 1), (1, 1)),
                                 dimension_numbers=dn)
    y = jnp.maximum(y + b1[None, :, None, None], 0.0)
    y = lax.conv_general_dilated(y, w2, (1, 1), ((1, 1), (1, 1)),
                                 dimension_numbers=dn)
    y = jnp.maximum(y + b2[None, :, None, None], 0.0)
    return y


if __name__ == "__main__":
    # Small deterministic problem: batch=2, in_channels=4, out_channels=8, 16x16
    N, Cin, Cout, H, W = 2, 4, 8, 16, 16

    key = jax.random.PRNGKey(0)
    kx, kw1, kb1, kw2, kb2 = jax.random.split(key, 5)

    x = jax.random.normal(kx, (N, Cin, H, W), dtype=jnp.float32)

    # PyTorch-like uniform(-1/sqrt(fan_in), 1/sqrt(fan_in)) init
    bound1 = 1.0 / np.sqrt(Cin * 3 * 3)
    w1 = jax.random.uniform(kw1, (Cout, Cin, 3, 3), jnp.float32, -bound1, bound1)
    b1 = jax.random.uniform(kb1, (Cout,), jnp.float32, -bound1, bound1)

    bound2 = 1.0 / np.sqrt(Cout * 3 * 3)
    w2 = jax.random.uniform(kw2, (Cout, Cout, 3, 3), jnp.float32, -bound2, bound2)
    b2 = jax.random.uniform(kb2, (Cout,), jnp.float32, -bound2, bound2)

    ref = jax.block_until_ready(_ref_double_conv(x, w1, b1, w2, b2))

    # 1) f32-operand path: tight check of the kernel structure / indexing.
    out_f32 = jax.block_until_ready(
        double_conv(x, w1, b1, w2, b2, matmul_dtype=jnp.float32))
    assert out_f32.shape == (N, Cout, H, W)
    np.testing.assert_allclose(np.asarray(out_f32), np.asarray(ref),
                               rtol=1e-4, atol=1e-4)

    # 2) Default bf16-operand path (MXU-native on v5e/v6e/v7x, f32 accumulate):
    #    looser tolerance only reflects the bf16 operand rounding.
    out_bf16 = jax.block_until_ready(double_conv(x, w1, b1, w2, b2))
    assert out_bf16.shape == (N, Cout, H, W)
    np.testing.assert_allclose(np.asarray(out_bf16), np.asarray(ref),
                               rtol=5e-2, atol=5e-2)

    print("KERNEL_OK")
</pallas_src>

<mosaic_0001>
module attributes {stable_mosaic.version = 11 : i64} {
  func.func @kernel(%arg0: i32, %arg1: memref<2x16x64xf32, #tpu.memory_space<vmem>>, %arg2: memref<3x64x128xf32, #tpu.memory_space<vmem>>, %arg3: memref<1x128xf32, #tpu.memory_space<vmem>>, %arg4: memref<3x128x128xf32, #tpu.memory_space<vmem>>, %arg5: memref<1x128xf32, #tpu.memory_space<vmem>>, %arg6: memref<2x16x128xf32, #tpu.memory_space<vmem>>, %arg7: memref<36x64xf32, #tpu.memory_space<vmem>>, %arg8: memref<36x128xf32, #tpu.memory_space<vmem>>) attributes {dimension_semantics = [#tpu.dimension_semantics<parallel>], iteration_bounds = array<i64: 1>, scalar_prefetch = 0 : i64, scratch_operands = 2 : i64, tpu.core_type = #tpu.core_type<tc>, window_params = [{transform_indices = @transform_0, window_bounds = array<i64: 2, 16, 64>}, {pipeline_mode = #tpu.pipeline_mode<synchronous>, transform_indices = @transform_1, window_bounds = array<i64: 3, 64, 128>}, {pipeline_mode = #tpu.pipeline_mode<synchronous>, transform_indices = @transform_2, window_bounds = array<i64: 1, 128>}, {pipeline_mode = #tpu.pipeline_mode<synchronous>, transform_indices = @transform_3, window_bounds = array<i64: 3, 128, 128>}, {pipeline_mode = #tpu.pipeline_mode<synchronous>, transform_indices = @transform_4, window_bounds = array<i64: 1, 128>}, {transform_indices = @transform_5, window_bounds = array<i64: 2, 16, 128>}]} {
    %cst = arith.constant 0.000000e+00 : f32
    %0 = vector.broadcast %cst : f32 to vector<1x64xf32>
    %c0 = arith.constant 0 : index
    %c0_0 = arith.constant 0 : index
    %1 = vector.load %arg7[%c0, %c0_0] : memref<36x64xf32, #tpu.memory_space<vmem>>, vector<1x64xf32>
    tpu.vector_store %arg7[%c0, %c0_0], %0 {strides = array<i32>} : memref<36x64xf32, #tpu.memory_space<vmem>>, vector<1x64xf32>,
    %cst_1 = arith.constant 0.000000e+00 : f32
    %2 = vector.broadcast %cst_1 : f32 to vector<1x64xf32>
    %c17 = arith.constant 17 : index
    %c0_2 = arith.constant 0 : index
    %3 = vector.load %arg7[%c17, %c0_2] : memref<36x64xf32, #tpu.memory_space<vmem>>, vector<1x64xf32>
    tpu.vector_store %arg7[%c17, %c0_2], %2 {strides = array<i32>} : memref<36x64xf32, #tpu.memory_space<vmem>>, vector<1x64xf32>,
    %cst_3 = arith.constant 0.000000e+00 : f32
    %4 = vector.broadcast %cst_3 : f32 to vector<1x128xf32>
    %c0_4 = arith.constant 0 : index
    %c0_5 = arith.constant 0 : index
    %5 = vector.load %arg8[%c0_4, %c0_5] : memref<36x128xf32, #tpu.memory_space<vmem>>, vector<1x128xf32>
    tpu.vector_store %arg8[%c0_4, %c0_5], %4 {strides = array<i32>} : memref<36x128xf32, #tpu.memory_space<vmem>>, vector<1x128xf32>,
    %cst_6 = arith.constant 0.000000e+00 : f32
    %6 = vector.broadcast %cst_6 : f32 to vector<1x128xf32>
    %c17_7 = arith.constant 17 : index
    %c0_8 = arith.constant 0 : index
    %7 = vector.load %arg8[%c17_7, %c0_8] : memref<36x128xf32, #tpu.memory_space<vmem>>, vector<1x128xf32>
    tpu.vector_store %arg8[%c17_7, %c0_8], %6 {strides = array<i32>} : memref<36x128xf32, #tpu.memory_space<vmem>>, vector<1x128xf32>,
    %c0_9 = arith.constant 0 : index
    %c0_10 = arith.constant 0 : index
    %c0_11 = arith.constant 0 : index
    %8 = vector.load %arg1[%c0_9, %c0_10, %c0_11] : memref<2x16x64xf32, #tpu.memory_space<vmem>>, vector<1x16x64xf32>
    %9 = vector.shape_cast %8 : vector<1x16x64xf32> to vector<16x64xf32>
    %c1 = arith.constant 1 : index
    %c0_12 = arith.constant 0 : index
    %10 = vector.load %arg7[%c1, %c0_12] : memref<36x64xf32, #tpu.memory_space<vmem>>, vector<16x64xf32>
    tpu.vector_store %arg7[%c1, %c0_12], %9 {strides = array<i32>} : memref<36x64xf32, #tpu.memory_space<vmem>>, vector<16x64xf32>,
    %cst_13 = arith.constant 0.000000e+00 : f32
    %11 = vector.broadcast %cst_13 : f32 to vector<1x64xf32>
    %c18 = arith.constant 18 : index
    %c0_14 = arith.constant 0 : index
    %12 = vector.load %arg7[%c18, %c0_14] : memref<36x64xf32, #tpu.memory_space<vmem>>, vector<1x64xf32>
    tpu.vector_store %arg7[%c18, %c0_14], %11 {strides = array<i32>} : memref<36x64xf32, #tpu.memory_space<vmem>>, vector<1x64xf32>,
    %cst_15 = arith.constant 0.000000e+00 : f32
    %13 = vector.broadcast %cst_15 : f32 to vector<1x64xf32>
    %c35 = arith.constant 35 : index
    %c0_16 = arith.constant 0 : index
    %14 = vector.load %arg7[%c35, %c0_16] : memref<36x64xf32, #tpu.memory_space<vmem>>, vector<1x64xf32>
    tpu.vector_store %arg7[%c35, %c0_16], %13 {strides = array<i32>} : memref<36x64xf32, #tpu.memory_space<vmem>>, vector<1x64xf32>,
    %cst_17 = arith.constant 0.000000e+00 : f32
    %15 = vector.broadcast %cst_17 : f32 to vector<1x128xf32>
    %c18_18 = arith.constant 18 : index
    %c0_19 = arith.constant 0 : index
    %16 = vector.load %arg8[%c18_18, %c0_19] : memref<36x128xf32, #tpu.memory_space<vmem>>, vector<1x128xf32>
    tpu.vector_store %arg8[%c18_18, %c0_19], %15 {strides = array<i32>} : memref<36x128xf32, #tpu.memory_space<vmem>>, vector<1x128xf32>,
    %cst_20 = arith.constant 0.000000e+00 : f32
    %17 = vector.broadcast %cst_20 : f32 to vector<1x128xf32>
    %c35_21 = arith.constant 35 : index
    %c0_22 = arith.constant 0 : index
    %18 = vector.load %arg8[%c35_21, %c0_22] : memref<36x128xf32, #tpu.memory_space<vmem>>, vector<1x128xf32>
    tpu.vector_store %arg8[%c35_21, %c0_22], %17 {strides = array<i32>} : memref<36x128xf32, #tpu.memory_space<vmem>>, vector<1x128xf32>,
    %c1_23 = arith.constant 1 : index
    %c0_24 = arith.constant 0 : index
    %c0_25 = arith.constant 0 : index
    %19 = vector.load %arg1[%c1_23, %c0_24, %c0_25] : memref<2x16x64xf32, #tpu.memory_space<vmem>>, vector<1x16x64xf32>
    %20 = vector.shape_cast %19 : vector<1x16x64xf32> to vector<16x64xf32>
    %c19 = arith.constant 19 : index
    %c0_26 = arith.constant 0 : index
    %21 = vector.load %arg7[%c19, %c0_26] : memref<36x64xf32, #tpu.memory_space<vmem>>, vector<16x64xf32>
    tpu.vector_store %arg7[%c19, %c0_26], %20 {strides = array<i32>} : memref<36x64xf32, #tpu.memory_space<vmem>>, vector<16x64xf32>,
    %cst_27 = arith.constant 0.000000e+00 : f32
    %22 = vector.broadcast %cst_27 : f32 to vector<34x128xf32>
    %c0_28 = arith.constant 0 : index
    %c0_29 = arith.constant 0 : index
    %23 = vector.load %arg7[%c0_28, %c0_29] : memref<36x64xf32, #tpu.memory_space<vmem>>, vector<34x64xf32>
    %c0_30 = arith.constant 0 : index
    %c0_31 = arith.constant 0 : index
    %c0_32 = arith.constant 0 : index
    %24 = vector.load %arg2[%c0_30, %c0_31, %c0_32] : memref<3x64x128xf32, #tpu.memory_space<vmem>>, vector<1x64x128xf32>
    %25 = vector.shape_cast %24 : vector<1x64x128xf32> to vector<64x128xf32>
    %cst_33 = arith.constant dense<0.000000e+00> : vector<34x128xf32>
    %26 = tpu.matmul %23, %25, %cst_33 {dimension_numbers = #tpu.dot_dimension_numbers<[1], [0], [0], [1], [0, 0, 1, 1], [], []>} : vector<34x64xf32>, vector<64x128xf32>, vector<34x128xf32> -> vector<34x128xf32>
    %27 = arith.addf %22, %26 : vector<34x128xf32>
    %c1_34 = arith.constant 1 : index
    %c0_35 = arith.constant 0 : index
    %28 = vector.load %arg7[%c1_34, %c0_35] : memref<36x64xf32, #tpu.memory_space<vmem>>, vector<34x64xf32>
    %c1_36 = arith.constant 1 : index
    %c0_37 = arith.constant 0 : index
    %c0_38 = arith.constant 0 : index
    %29 = vector.load %arg2[%c1_36, %c0_37, %c0_38] : memref<3x64x128xf32, #tpu.memory_space<vmem>>, vector<1x64x128xf32>
    %30 = vector.shape_cast %29 : vector<1x64x128xf32> to vector<64x128xf32>
    %cst_39 = arith.constant dense<0.000000e+00> : vector<34x128xf32>
    %31 = tpu.matmul %28, %30, %cst_39 {dimension_numbers = #tpu.dot_dimension_numbers<[1], [0], [0], [1], [0, 0, 1, 1], [], []>} : vector<34x64xf32>, vector<64x128xf32>, vector<34x128xf32> -> vector<34x128xf32>
    %32 = arith.addf %27, %31 : vector<34x128xf32>
    %c2 = arith.constant 2 : index
    %c0_40 = arith.constant 0 : index
    %33 = vector.load %arg7[%c2, %c0_40] : memref<36x64xf32, #tpu.memory_space<vmem>>, vector<34x64xf32>
    %c2_41 = arith.constant 2 : index
    %c0_42 = arith.constant 0 : index
    %c0_43 = arith.constant 0 : index
    %34 = vector.load %arg2[%c2_41, %c0_42, %c0_43] : memref<3x64x128xf32, #tpu.memory_space<vmem>>, vector<1x64x128xf32>
    %35 = vector.shape_cast %34 : vector<1x64x128xf32> to vector<64x128xf32>
    %cst_44 = arith.constant dense<0.000000e+00> : vector<34x128xf32>
    %36 = tpu.matmul %33, %35, %cst_44 {dimension_numbers = #tpu.dot_dimension_numbers<[1], [0], [0], [1], [0, 0, 1, 1], [], []>} : vector<34x64xf32>, vector<64x128xf32>, vector<34x128xf32> -> vector<34x128xf32>
    %37 = arith.addf %32, %36 : vector<34x128xf32>
    %c0_45 = arith.constant 0 : index
    %c0_46 = arith.constant 0 : index
    %38 = vector.load %arg3[%c0_45, %c0_46] : memref<1x128xf32, #tpu.memory_space<vmem>>, vector<1x128xf32>
    %39 = vector.broadcast %38 : vector<1x128xf32> to vector<34x128xf32>
    %40 = arith.addf %37, %39 : vector<34x128xf32>
    %cst_47 = arith.constant 0.000000e+00 : f32
    %41 = vector.broadcast %cst_47 : f32 to vector<34x128xf32>
    %42 = arith.maximumf %40, %41 : vector<34x128xf32>
    %43 = vector.extract_strided_slice %42 {offsets = [0, 0], sizes = [16, 128], strides = [1, 1]} : vector<34x128xf32> to vector<16x128xf32>
    %c1_48 = arith.constant 1 : index
    %c0_49 = arith.constant 0 : index
    %44 = vector.load %arg8[%c1_48, %c0_49] : memref<36x128xf32, #tpu.memory_space<vmem>>, vector<16x128xf32>
    tpu.vector_store %arg8[%c1_48, %c0_49], %43 {strides = array<i32>} : memref<36x128xf32, #tpu.memory_space<vmem>>, vector<16x128xf32>,
    %45 = vector.extract_strided_slice %42 {offsets = [18, 0], sizes = [16, 128], strides = [1, 1]} : vector<34x128xf32> to vector<16x128xf32>
    %c19_50 = arith.constant 19 : index
    %c0_51 = arith.constant 0 : index
    %46 = vector.load %arg8[%c19_50, %c0_51] : memref<36x128xf32, #tpu.memory_space<vmem>>, vector<16x128xf32>
    tpu.vector_store %arg8[%c19_50, %c0_51], %45 {strides = array<i32>} : memref<36x128xf32, #tpu.memory_space<vmem>>, vector<16x128xf32>,
    %cst_52 = arith.constant 0.000000e+00 : f32
    %47 = vector.broadcast %cst_52 : f32 to vector<34x128xf32>
    %c0_53 = arith.constant 0 : index
    %c0_54 = arith.constant 0 : index
    %48 = vector.load %arg8[%c0_53, %c0_54] : memref<36x128xf32, #tpu.memory_space<vmem>>, vector<34x128xf32>
    %c0_55 = arith.constant 0 : index
    %c0_56 = arith.constant 0 : index
    %c0_57 = arith.constant 0 : index
    %49 = vector.load %arg4[%c0_55, %c0_56, %c0_57] : memref<3x128x128xf32, #tpu.memory_space<vmem>>, vector<1x128x128xf32>
    %50 = vector.shape_cast %49 : vector<1x128x128xf32> to vector<128x128xf32>
    %cst_58 = arith.constant dense<0.000000e+00> : vector<34x128xf32>
    %51 = tpu.matmul %48, %50, %cst_58 {dimension_numbers = #tpu.dot_dimension_numbers<[1], [0], [0], [1], [0, 0, 1, 1], [], []>} : vector<34x128xf32>, vector<128x128xf32>, vector<34x128xf32> -> vector<34x128xf32>
    %52 = arith.addf %47, %51 : vector<34x128xf32>
    %c1_59 = arith.constant 1 : index
    %c0_60 = arith.constant 0 : index
    %53 = vector.load %arg8[%c1_59, %c0_60] : memref<36x128xf32, #tpu.memory_space<vmem>>, vector<34x128xf32>
    %c1_61 = arith.constant 1 : index
    %c0_62 = arith.constant 0 : index
    %c0_63 = arith.constant 0 : index
    %54 = vector.load %arg4[%c1_61, %c0_62, %c0_63] : memref<3x128x128xf32, #tpu.memory_space<vmem>>, vector<1x128x128xf32>
    %55 = vector.shape_cast %54 : vector<1x128x128xf32> to vector<128x128xf32>
    %cst_64 = arith.constant dense<0.000000e+00> : vector<34x128xf32>
    %56 = tpu.matmul %53, %55, %cst_64 {dimension_numbers = #tpu.dot_dimension_numbers<[1], [0], [0], [1], [0, 0, 1, 1], [], []>} : vector<34x128xf32>, vector<128x128xf32>, vector<34x128xf32> -> vector<34x128xf32>
    %57 = arith.addf %52, %56 : vector<34x128xf32>
    %c2_65 = arith.constant 2 : index
    %c0_66 = arith.constant 0 : index
    %58 = vector.load %arg8[%c2_65, %c0_66] : memref<36x128xf32, #tpu.memory_space<vmem>>, vector<34x128xf32>
    %c2_67 = arith.constant 2 : index
    %c0_68 = arith.constant 0 : index
    %c0_69 = arith.constant 0 : index
    %59 = vector.load %arg4[%c2_67, %c0_68, %c0_69] : memref<3x128x128xf32, #tpu.memory_space<vmem>>, vector<1x128x128xf32>
    %60 = vector.shape_cast %59 : vector<1x128x128xf32> to vector<128x128xf32>
    %cst_70 = arith.constant dense<0.000000e+00> : vector<34x128xf32>
    %61 = tpu.matmul %58, %60, %cst_70 {dimension_numbers = #tpu.dot_dimension_numbers<[1], [0], [0], [1], [0, 0, 1, 1], [], []>} : vector<34x128xf32>, vector<128x128xf32>, vector<34x128xf32> -> vector<34x128xf32>
    %62 = arith.addf %57, %61 : vector<34x128xf32>
    %c0_71 = arith.constant 0 : index
    %c0_72 = arith.constant 0 : index
    %63 = vector.load %arg5[%c0_71, %c0_72] : memref<1x128xf32, #tpu.memory_space<vmem>>, vector<1x128xf32>
    %64 = vector.broadcast %63 : vector<1x128xf32> to vector<34x128xf32>
    %65 = arith.addf %62, %64 : vector<34x128xf32>
    %cst_73 = arith.constant 0.000000e+00 : f32
    %66 = vector.broadcast %cst_73 : f32 to vector<34x128xf32>
    %67 = arith.maximumf %65, %66 : vector<34x128xf32>
    %68 = vector.extract_strided_slice %67 {offsets = [0, 0], sizes = [16, 128], strides = [1, 1]} : vector<34x128xf32> to vector<16x128xf32>
    %c0_74 = arith.constant 0 : index
    %c0_75 = arith.constant 0 : index
    %c0_76 = arith.constant 0 : index
    %69 = vector.load %arg6[%c0_74, %c0_75, %c0_76] : memref<2x16x128xf32, #tpu.memory_space<vmem>>, vector<1x16x128xf32>
    %70 = vector.shape_cast %69 : vector<1x16x128xf32> to vector<16x128xf32>
    %71 = vector.shape_cast %68 : vector<16x128xf32> to vector<1x16x128xf32>
    tpu.vector_store %arg6[%c0_74, %c0_75, %c0_76], %71 {strides = array<i32>} : memref<2x16x128xf32, #tpu.memory_space<vmem>>, vector<1x16x128xf32>,
    %72 = vector.extract_strided_slice %67 {offsets = [18, 0], sizes = [16, 128], strides = [1, 1]} : vector<34x128xf32> to vector<16x128xf32>
    %c1_77 = arith.constant 1 : index
    %c0_78 = arith.constant 0 : index
    %c0_79 = arith.constant 0 : index
    %73 = vector.load %arg6[%c1_77, %c0_78, %c0_79] : memref<2x16x128xf32, #tpu.memory_space<vmem>>, vector<1x16x128xf32>
    %74 = vector.shape_cast %73 : vector<1x16x128xf32> to vector<16x128xf32>
    %75 = vector.shape_cast %72 : vector<16x128xf32> to vector<1x16x128xf32>
    tpu.vector_store %arg6[%c1_77, %c0_78, %c0_79], %75 {strides = array<i32>} : memref<2x16x128xf32, #tpu.memory_space<vmem>>, vector<1x16x128xf32>,
    return
  }
  func.func @transform_0(%arg0: i32) -> (i32, i32, i32) {
    %c0_i32 = arith.constant 0 : i32
    %c0_i32_0 = arith.constant 0 : i32
    %c0_i32_1 = arith.constant 0 : i32
    return %arg0, %c0_i32, %c0_i32_0 : i32, i32, i32
  }
  func.func @transform_1(%arg0: i32) -> (i32, i32, i32) {
    %c0_i32 = arith.constant 0 : i32
    %c0_i32_0 = arith.constant 0 : i32
    %c0_i32_1 = arith.constant 0 : i32
    %c0_i32_2 = arith.constant 0 : i32
    return %c0_i32, %c0_i32_0, %c0_i32_1 : i32, i32, i32
  }
  func.func @transform_2(%arg0: i32) -> (i32, i32) {
    %c0_i32 = arith.constant 0 : i32
    %c0_i32_0 = arith.constant 0 : i32
    %c0_i32_1 = arith.constant 0 : i32
    return %c0_i32, %c0_i32_0 : i32, i32
  }
  func.func @transform_3(%arg0: i32) -> (i32, i32, i32) {
    %c0_i32 = arith.constant 0 : i32
    %c0_i32_0 = arith.constant 0 : i32
    %c0_i32_1 = arith.constant 0 : i32
    %c0_i32_2 = arith.constant 0 : i32
    return %c0_i32, %c0_i32_0, %c0_i32_1 : i32, i32, i32
  }
  func.func @transform_4(%arg0: i32) -> (i32, i32) {
    %c0_i32 = arith.constant 0 : i32
    %c0_i32_0 = arith.constant 0 : i32
    %c0_i32_1 = arith.constant 0 : i32
    return %c0_i32, %c0_i32_0 : i32, i32
  }
  func.func @transform_5(%arg0: i32) -> (i32, i32, i32) {
    %c0_i32 = arith.constant 0 : i32
    %c0_i32_0 = arith.constant 0 : i32
    %c0_i32_1 = arith.constant 0 : i32
    return %arg0, %c0_i32, %c0_i32_0 : i32, i32, i32
  }
}

module attributes {stable_mosaic.version = 11 : i64} {
  func.func @kernel(%arg0: i32, %arg1: memref<2x16x64xf32, #tpu.memory_space<vmem>>, %arg2: memref<3x64x128xf32, #tpu.memory_space<vmem>>, %arg3: memref<1x128xf32, #tpu.memory_space<vmem>>, %arg4: memref<3x128x128xf32, #tpu.memory_space<vmem>>, %arg5: memref<1x128xf32, #tpu.memory_space<vmem>>, %arg6: memref<2x16x128xf32, #tpu.memory_space<vmem>>, %arg7: memref<36x64xf32, #tpu.memory_space<vmem>>, %arg8: memref<36x128xf32, #tpu.memory_space<vmem>>) attributes {dimension_semantics = [#tpu.dimension_semantics<parallel>], iteration_bounds = array<i64: 1>, scalar_prefetch = 0 : i64, scratch_operands = 2 : i64, tpu.core_type = #tpu.core_type<tc>, window_params = [{transform_indices = @transform_0, window_bounds = array<i64: 2, 16, 64>}, {pipeline_mode = #tpu.pipeline_mode<synchronous>, transform_indices = @transform_1, window_bounds = array<i64: 3, 64, 128>}, {pipeline_mode = #tpu.pipeline_mode<synchronous>, transform_indices = @transform_2, window_bounds = array<i64: 1, 128>}, {pipeline_mode = #tpu.pipeline_mode<synchronous>, transform_indices = @transform_3, window_bounds = array<i64: 3, 128, 128>}, {pipeline_mode = #tpu.pipeline_mode<synchronous>, transform_indices = @transform_4, window_bounds = array<i64: 1, 128>}, {transform_indices = @transform_5, window_bounds = array<i64: 2, 16, 128>}]} {
    %cst = arith.constant 0.000000e+00 : f32
    %0 = vector.broadcast %cst : f32 to vector<1x64xf32>
    %c0 = arith.constant 0 : index
    %c0_0 = arith.constant 0 : index
    %1 = vector.load %arg7[%c0, %c0_0] : memref<36x64xf32, #tpu.memory_space<vmem>>, vector<1x64xf32>
    tpu.vector_store %arg7[%c0, %c0_0], %0 {strides = array<i32>} : memref<36x64xf32, #tpu.memory_space<vmem>>, vector<1x64xf32>,
    %cst_1 = arith.constant 0.000000e+00 : f32
    %2 = vector.broadcast %cst_1 : f32 to vector<1x64xf32>
    %c17 = arith.constant 17 : index
    %c0_2 = arith.constant 0 : index
    %3 = vector.load %arg7[%c17, %c0_2] : memref<36x64xf32, #tpu.memory_space<vmem>>, vector<1x64xf32>
    tpu.vector_store %arg7[%c17, %c0_2], %2 {strides = array<i32>} : memref<36x64xf32, #tpu.memory_space<vmem>>, vector<1x64xf32>,
    %cst_3 = arith.constant 0.000000e+00 : f32
    %4 = vector.broadcast %cst_3 : f32 to vector<1x128xf32>
    %c0_4 = arith.constant 0 : index
    %c0_5 = arith.constant 0 : index
    %5 = vector.load %arg8[%c0_4, %c0_5] : memref<36x128xf32, #tpu.memory_space<vmem>>, vector<1x128xf32>
    tpu.vector_store %arg8[%c0_4, %c0_5], %4 {strides = array<i32>} : memref<36x128xf32, #tpu.memory_space<vmem>>, vector<1x128xf32>,
    %cst_6 = arith.constant 0.000000e+00 : f32
    %6 = vector.broadcast %cst_6 : f32 to vector<1x128xf32>
    %c17_7 = arith.constant 17 : index
    %c0_8 = arith.constant 0 : index
    %7 = vector.load %arg8[%c17_7, %c0_8] : memref<36x128xf32, #tpu.memory_space<vmem>>, vector<1x128xf32>
    tpu.vector_store %arg8[%c17_7, %c0_8], %6 {strides = array<i32>} : memref<36x128xf32, #tpu.memory_space<vmem>>, vector<1x128xf32>,
    %c0_9 = arith.constant 0 : index
    %c0_10 = arith.constant 0 : index
    %c0_11 = arith.constant 0 : index
    %8 = vector.load %arg1[%c0_9, %c0_10, %c0_11] : memref<2x16x64xf32, #tpu.memory_space<vmem>>, vector<1x16x64xf32>
    %9 = vector.shape_cast %8 : vector<1x16x64xf32> to vector<16x64xf32>
    %c1 = arith.constant 1 : index
    %c0_12 = arith.constant 0 : index
    %10 = vector.load %arg7[%c1, %c0_12] : memref<36x64xf32, #tpu.memory_space<vmem>>, vector<16x64xf32>
    tpu.vector_store %arg7[%c1, %c0_12], %9 {strides = array<i32>} : memref<36x64xf32, #tpu.memory_space<vmem>>, vector<16x64xf32>,
    %cst_13 = arith.constant 0.000000e+00 : f32
    %11 = vector.broadcast %cst_13 : f32 to vector<1x64xf32>
    %c18 = arith.constant 18 : index
    %c0_14 = arith.constant 0 : index
    %12 = vector.load %arg7[%c18, %c0_14] : memref<36x64xf32, #tpu.memory_space<vmem>>, vector<1x64xf32>
    tpu.vector_store %arg7[%c18, %c0_14], %11 {strides = array<i32>} : memref<36x64xf32, #tpu.memory_space<vmem>>, vector<1x64xf32>,
    %cst_15 = arith.constant 0.000000e+00 : f32
    %13 = vector.broadcast %cst_15 : f32 to vector<1x64xf32>
    %c35 = arith.constant 35 : index
    %c0_16 = arith.constant 0 : index
    %14 = vector.load %arg7[%c35, %c0_16] : memref<36x64xf32, #tpu.memory_space<vmem>>, vector<1x64xf32>
    tpu.vector_store %arg7[%c35, %c0_16], %13 {strides = array<i32>} : memref<36x64xf32, #tpu.memory_space<vmem>>, vector<1x64xf32>,
    %cst_17 = arith.constant 0.000000e+00 : f32
    %15 = vector.broadcast %cst_17 : f32 to vector<1x128xf32>
    %c18_18 = arith.constant 18 : index
    %c0_19 = arith.constant 0 : index
    %16 = vector.load %arg8[%c18_18, %c0_19] : memref<36x128xf32, #tpu.memory_space<vmem>>, vector<1x128xf32>
    tpu.vector_store %arg8[%c18_18, %c0_19], %15 {strides = array<i32>} : memref<36x128xf32, #tpu.memory_space<vmem>>, vector<1x128xf32>,
    %cst_20 = arith.constant 0.000000e+00 : f32
    %17 = vector.broadcast %cst_20 : f32 to vector<1x128xf32>
    %c35_21 = arith.constant 35 : index
    %c0_22 = arith.constant 0 : index
    %18 = vector.load %arg8[%c35_21, %c0_22] : memref<36x128xf32, #tpu.memory_space<vmem>>, vector<1x128xf32>
    tpu.vector_store %arg8[%c35_21, %c0_22], %17 {strides = array<i32>} : memref<36x128xf32, #tpu.memory_space<vmem>>, vector<1x128xf32>,
    %c1_23 = arith.constant 1 : index
    %c0_24 = arith.constant 0 : index
    %c0_25 = arith.constant 0 : index
    %19 = vector.load %arg1[%c1_23, %c0_24, %c0_25] : memref<2x16x64xf32, #tpu.memory_space<vmem>>, vector<1x16x64xf32>
    %20 = vector.shape_cast %19 : vector<1x16x64xf32> to vector<16x64xf32>
    %c19 = arith.constant 19 : index
    %c0_26 = arith.constant 0 : index
    %21 = vector.load %arg7[%c19, %c0_26] : memref<36x64xf32, #tpu.memory_space<vmem>>, vector<16x64xf32>
    tpu.vector_store %arg7[%c19, %c0_26], %20 {strides = array<i32>} : memref<36x64xf32, #tpu.memory_space<vmem>>, vector<16x64xf32>,
    %cst_27 = arith.constant 0.000000e+00 : f32
    %22 = vector.broadcast %cst_27 : f32 to vector<34x128xf32>
    %c0_28 = arith.constant 0 : index
    %c0_29 = arith.constant 0 : index
    %23 = vector.load %arg7[%c0_28, %c0_29] : memref<36x64xf32, #tpu.memory_space<vmem>>, vector<34x64xf32>
    %c0_30 = arith.constant 0 : index
    %c0_31 = arith.constant 0 : index
    %c0_32 = arith.constant 0 : index
    %24 = vector.load %arg2[%c0_30, %c0_31, %c0_32] : memref<3x64x128xf32, #tpu.memory_space<vmem>>, vector<1x64x128xf32>
    %25 = vector.shape_cast %24 : vector<1x64x128xf32> to vector<64x128xf32>
    %cst_33 = arith.constant dense<0.000000e+00> : vector<34x128xf32>
    %26 = tpu.matmul %23, %25, %cst_33 {dimension_numbers = #tpu.dot_dimension_numbers<[1], [0], [0], [1], [0, 0, 1, 1], [], []>} : vector<34x64xf32>, vector<64x128xf32>, vector<34x128xf32> -> vector<34x128xf32>
    %27 = arith.addf %22, %26 : vector<34x128xf32>
    %c1_34 = arith.constant 1 : index
    %c0_35 = arith.constant 0 : index
    %28 = vector.load %arg7[%c1_34, %c0_35] : memref<36x64xf32, #tpu.memory_space<vmem>>, vector<34x64xf32>
    %c1_36 = arith.constant 1 : index
    %c0_37 = arith.constant 0 : index
    %c0_38 = arith.constant 0 : index
    %29 = vector.load %arg2[%c1_36, %c0_37, %c0_38] : memref<3x64x128xf32, #tpu.memory_space<vmem>>, vector<1x64x128xf32>
    %30 = vector.shape_cast %29 : vector<1x64x128xf32> to vector<64x128xf32>
    %cst_39 = arith.constant dense<0.000000e+00> : vector<34x128xf32>
    %31 = tpu.matmul %28, %30, %cst_39 {dimension_numbers = #tpu.dot_dimension_numbers<[1], [0], [0], [1], [0, 0, 1, 1], [], []>} : vector<34x64xf32>, vector<64x128xf32>, vector<34x128xf32> -> vector<34x128xf32>
    %32 = arith.addf %27, %31 : vector<34x128xf32>
    %c2 = arith.constant 2 : index
    %c0_40 = arith.constant 0 : index
    %33 = vector.load %arg7[%c2, %c0_40] : memref<36x64xf32, #tpu.memory_space<vmem>>, vector<34x64xf32>
    %c2_41 = arith.constant 2 : index
    %c0_42 = arith.constant 0 : index
    %c0_43 = arith.constant 0 : index
    %34 = vector.load %arg2[%c2_41, %c0_42, %c0_43] : memref<3x64x128xf32, #tpu.memory_space<vmem>>, vector<1x64x128xf32>
    %35 = vector.shape_cast %34 : vector<1x64x128xf32> to vector<64x128xf32>
    %cst_44 = arith.constant dense<0.000000e+00> : vector<34x128xf32>
    %36 = tpu.matmul %33, %35, %cst_44 {dimension_numbers = #tpu.dot_dimension_numbers<[1], [0], [0], [1], [0, 0, 1, 1], [], []>} : vector<34x64xf32>, vector<64x128xf32>, vector<34x128xf32> -> vector<34x128xf32>
    %37 = arith.addf %32, %36 : vector<34x128xf32>
    %c0_45 = arith.constant 0 : index
    %c0_46 = arith.constant 0 : index
    %38 = vector.load %arg3[%c0_45, %c0_46] : memref<1x128xf32, #tpu.memory_space<vmem>>, vector<1x128xf32>
    %39 = vector.broadcast %38 : vector<1x128xf32> to vector<34x128xf32>
    %40 = arith.addf %37, %39 : vector<34x128xf32>
    %cst_47 = arith.constant 0.000000e+00 : f32
    %41 = vector.broadcast %cst_47 : f32 to vector<34x128xf32>
    %42 = arith.maximumf %40, %41 : vector<34x128xf32>
    %43 = vector.extract_strided_slice %42 {offsets = [0, 0], sizes = [16, 128], strides = [1, 1]} : vector<34x128xf32> to vector<16x128xf32>
    %c1_48 = arith.constant 1 : index
    %c0_49 = arith.constant 0 : index
    %44 = vector.load %arg8[%c1_48, %c0_49] : memref<36x128xf32, #tpu.memory_space<vmem>>, vector<16x128xf32>
    tpu.vector_store %arg8[%c1_48, %c0_49], %43 {strides = array<i32>} : memref<36x128xf32, #tpu.memory_space<vmem>>, vector<16x128xf32>,
    %45 = vector.extract_strided_slice %42 {offsets = [18, 0], sizes = [16, 128], strides = [1, 1]} : vector<34x128xf32> to vector<16x128xf32>
    %c19_50 = arith.constant 19 : index
    %c0_51 = arith.constant 0 : index
    %46 = vector.load %arg8[%c19_50, %c0_51] : memref<36x128xf32, #tpu.memory_space<vmem>>, vector<16x128xf32>
    tpu.vector_store %arg8[%c19_50, %c0_51], %45 {strides = array<i32>} : memref<36x128xf32, #tpu.memory_space<vmem>>, vector<16x128xf32>,
    %cst_52 = arith.constant 0.000000e+00 : f32
    %47 = vector.broadcast %cst_52 : f32 to vector<34x128xf32>
    %c0_53 = arith.constant 0 : index
    %c0_54 = arith.constant 0 : index
    %48 = vector.load %arg8[%c0_53, %c0_54] : memref<36x128xf32, #tpu.memory_space<vmem>>, vector<34x128xf32>
    %c0_55 = arith.constant 0 : index
    %c0_56 = arith.constant 0 : index
    %c0_57 = arith.constant 0 : index
    %49 = vector.load %arg4[%c0_55, %c0_56, %c0_57] : memref<3x128x128xf32, #tpu.memory_space<vmem>>, vector<1x128x128xf32>
    %50 = vector.shape_cast %49 : vector<1x128x128xf32> to vector<128x128xf32>
    %cst_58 = arith.constant dense<0.000000e+00> : vector<34x128xf32>
    %51 = tpu.matmul %48, %50, %cst_58 {dimension_numbers = #tpu.dot_dimension_numbers<[1], [0], [0], [1], [0, 0, 1, 1], [], []>} : vector<34x128xf32>, vector<128x128xf32>, vector<34x128xf32> -> vector<34x128xf32>
    %52 = arith.addf %47, %51 : vector<34x128xf32>
    %c1_59 = arith.constant 1 : index
    %c0_60 = arith.constant 0 : index
    %53 = vector.load %arg8[%c1_59, %c0_60] : memref<36x128xf32, #tpu.memory_space<vmem>>, vector<34x128xf32>
    %c1_61 = arith.constant 1 : index
    %c0_62 = arith.constant 0 : index
    %c0_63 = arith.constant 0 : index
    %54 = vector.load %arg4[%c1_61, %c0_62, %c0_63] : memref<3x128x128xf32, #tpu.memory_space<vmem>>, vector<1x128x128xf32>
    %55 = vector.shape_cast %54 : vector<1x128x128xf32> to vector<128x128xf32>
    %cst_64 = arith.constant dense<0.000000e+00> : vector<34x128xf32>
    %56 = tpu.matmul %53, %55, %cst_64 {dimension_numbers = #tpu.dot_dimension_numbers<[1], [0], [0], [1], [0, 0, 1, 1], [], []>} : vector<34x128xf32>, vector<128x128xf32>, vector<34x128xf32> -> vector<34x128xf32>
    %57 = arith.addf %52, %56 : vector<34x128xf32>
    %c2_65 = arith.constant 2 : index
    %c0_66 = arith.constant 0 : index
    %58 = vector.load %arg8[%c2_65, %c0_66] : memref<36x128xf32, #tpu.memory_space<vmem>>, vector<34x128xf32>
    %c2_67 = arith.constant 2 : index
    %c0_68 = arith.constant 0 : index
    %c0_69 = arith.constant 0 : index
    %59 = vector.load %arg4[%c2_67, %c0_68, %c0_69] : memref<3x128x128xf32, #tpu.memory_space<vmem>>, vector<1x128x128xf32>
    %60 = vector.shape_cast %59 : vector<1x128x128xf32> to vector<128x128xf32>
    %cst_70 = arith.constant dense<0.000000e+00> : vector<34x128xf32>
    %61 = tpu.matmul %58, %60, %cst_70 {dimension_numbers = #tpu.dot_dimension_numbers<[1], [0], [0], [1], [0, 0, 1, 1], [], []>} : vector<34x128xf32>, vector<128x128xf32>, vector<34x128xf32> -> vector<34x128xf32>
    %62 = arith.addf %57, %61 : vector<34x128xf32>
    %c0_71 = arith.constant 0 : index
    %c0_72 = arith.constant 0 : index
    %63 = vector.load %arg5[%c0_71, %c0_72] : memref<1x128xf32, #tpu.memory_space<vmem>>, vector<1x128xf32>
    %64 = vector.broadcast %63 : vector<1x128xf32> to vector<34x128xf32>
    %65 = arith.addf %62, %64 : vector<34x128xf32>
    %cst_73 = arith.constant 0.000000e+00 : f32
    %66 = vector.broadcast %cst_73 : f32 to vector<34x128xf32>
    %67 = arith.maximumf %65, %66 : vector<34x128xf32>
    %68 = vector.extract_strided_slice %67 {offsets = [0, 0], sizes = [16, 128], strides = [1, 1]} : vector<34x128xf32> to vector<16x128xf32>
    %c0_74 = arith.constant 0 : index
    %c0_75 = arith.constant 0 : index
    %c0_76 = arith.constant 0 : index
    %69 = vector.load %arg6[%c0_74, %c0_75, %c0_76] : memref<2x16x128xf32, #tpu.memory_space<vmem>>, vector<1x16x128xf32>
    %70 = vector.shape_cast %69 : vector<1x16x128xf32> to vector<16x128xf32>
    %71 = vector.shape_cast %68 : vector<16x128xf32> to vector<1x16x128xf32>
    tpu.vector_store %arg6[%c0_74, %c0_75, %c0_76], %71 {strides = array<i32>} : memref<2x16x128xf32, #tpu.memory_space<vmem>>, vector<1x16x128xf32>,
    %72 = vector.extract_strided_slice %67 {offsets = [18, 0], sizes = [16, 128], strides = [1, 1]} : vector<34x128xf32> to vector<16x128xf32>
    %c1_77 = arith.constant 1 : index
    %c0_78 = arith.constant 0 : index
    %c0_79 = arith.constant 0 : index
    %73 = vector.load %arg6[%c1_77, %c0_78, %c0_79] : memref<2x16x128xf32, #tpu.memory_space<vmem>>, vector<1x16x128xf32>
    %74 = vector.shape_cast %73 : vector<1x16x128xf32> to vector<16x128xf32>
    %75 = vector.shape_cast %72 : vector<16x128xf32> to vector<1x16x128xf32>
    tpu.vector_store %arg6[%c1_77, %c0_78, %c0_79], %75 {strides = array<i32>} : memref<2x16x128xf32, #tpu.memory_space<vmem>>, vector<1x16x128xf32>,
    return
  }
  func.func @transform_0(%arg0: i32) -> (i32, i32, i32) {
    %c0_i32 = arith.constant 0 : i32
    %c0_i32_0 = arith.constant 0 : i32
    %c0_i32_1 = arith.constant 0 : i32
    return %arg0, %c0_i32, %c0_i32_0 : i32, i32, i32
  }
  func.func @transform_1(%arg0: i32) -> (i32, i32, i32) {
    %c0_i32 = arith.constant 0 : i32
    %c0_i32_0 = arith.constant 0 : i32
    %c0_i32_1 = arith.constant 0 : i32
    %c0_i32_2 = arith.constant 0 : i32
    return %c0_i32, %c0_i32_0, %c0_i32_1 : i32, i32, i32
  }
  func.func @transform_2(%arg0: i32) -> (i32, i32) {
    %c0_i32 = arith.constant 0 : i32
    %c0_i32_0 = arith.constant 0 : i32
    %c0_i32_1 = arith.constant 0 : i32
    return %c0_i32, %c0_i32_0 : i32, i32
  }
  func.func @transform_3(%arg0: i32) -> (i32, i32, i32) {
    %c0_i32 = arith.constant 0 : i32
    %c0_i32_0 = arith.constant 0 : i32
    %c0_i32_1 = arith.constant 0 : i32
    %c0_i32_2 = arith.constant 0 : i32
    return %c0_i32, %c0_i32_0, %c0_i32_1 : i32, i32, i32
  }
  func.func @transform_4(%arg0: i32) -> (i32, i32) {
    %c0_i32 = arith.constant 0 : i32
    %c0_i32_0 = arith.constant 0 : i32
    %c0_i32_1 = arith.constant 0 : i32
    return %c0_i32, %c0_i32_0 : i32, i32
  }
  func.func @transform_5(%arg0: i32) -> (i32, i32, i32) {
    %c0_i32 = arith.constant 0 : i32
    %c0_i32_0 = arith.constant 0 : i32
    %c0_i32_1 = arith.constant 0 : i32
    return %arg0, %c0_i32, %c0_i32_0 : i32, i32, i32
  }
}

</mosaic_0001>

<bundles_post_ra>
// kernel: tpu_custom_call.1
= control target key start
LH: loop header
LB: loop body
LE: loop exit
PB: predicated region body
PF: predicated region fallthrough
CT: control target
= control target key end

     0   :  { %10 = vsyncpa [#allocation5], 0  ;;  %s1519_s0 = inlined_call_operand.hbm [shape: f32[2,16,64], index: 0, kind: input, shape index: {}]   ;;  %s1520_s1 = inlined_call_operand.hbm [shape: f32[3,64,128], index: 1, kind: input, shape index: {}]   ;;  %s1521_s2 = inlined_call_operand.vmem [shape: f32[1,128], index: 2, kind: input, shape index: {}]   ;;  %s1522_s3 = inlined_call_operand.hbm [shape: f32[3,128,128], index: 3, kind: input, shape index: {}]   ;;  %s1523_s4 = inlined_call_operand.vmem [shape: f32[1,128], index: 4, kind: input, shape index: {}]   ;;  %s1524_s5 = inlined_call_operand.hbm [shape: f32[2,16,128], index: 5, kind: output, shape index: {}]  }
   0x1   :  { %11 = vsyncpa [#allocation8], 0 }
   0x2   :  { %12 = vsyncpa [#allocation6], 0  ;;  %s1292_s18 = smov [#allocation7]   ;;  %s1293_s20 = smov [#allocation4]  }
   0x3   :  { %s30_s19 = sshll.u32 %s1292_s18, 4  ;;  %s18_s21 = sshll.u32 %s1293_s20, 4  ;;  %s31_s19 = int_to_ptr.vmem [resolvable:$true] %s30_s19  ;;  %s19_s21 = int_to_ptr.vmem [resolvable:$true] %s18_s21 }
   0x4   :  { %s1214_s22 = scalar_lea.vmem %s31_s19, 3072  ;;  %p1219_p1 = scmp.lt.s32.totalorder %s31_s19, %s31_s19 }
   0x5   :  { %p1215_p0 = scmp.ne.s32.totalorder %s31_s19, %s1214_s22  ;;  %p1220_p2 = scmp.lt.s32.totalorder %s1214_s22, %s1214_s22 }
   0x7   :  { %p1221_p3 = por %p1220_p2, %p1219_p1 }
   0x9   :  { %p1222_p4 = pnand %p1221_p3, %p1215_p0 }
   0xb   :  { %1225 = shalt.err (!%p1222_p4)
}
   0xc   :  { %s1294_s23 = smov 128   ;;  %s1295_s24 = smov 8  }
   0xd   :  { %36 = dma.hbm_to_vmem [thread:$0]  %s1520_s1, 3072, %s31_s19, [#allocation8], %s1294_s23, %s1294_s23, %s1295_s24  }
   0xe   :  { %s1234_s27 = scalar_lea.vmem %s19_s21, 512  ;;  %p1239_p6 = scmp.lt.s32.totalorder %s19_s21, %s19_s21 }
   0xf   :  { %p1235_p5 = scmp.ne.s32.totalorder %s19_s21, %s1234_s27  ;;  %p1240_p7 = scmp.lt.s32.totalorder %s1234_s27, %s1234_s27 }
  0x11   :  { %p1241_p8 = por %p1240_p7, %p1239_p6 }
  0x13   :  { %p1242_p9 = pnand %p1241_p8, %p1235_p5 }
  0x15   :  { %1245 = shalt.err (!%p1242_p9)
}
  0x16   :  { %24 = dma.hbm_to_vmem [thread:$0]  %s1519_s0, 512, %s19_s21, [#allocation5], %s1294_s23, %s1294_s23, %s1295_s24  }
  0x17   :  { %s1296_s30 = smov [#allocation9]  }
  0x18   :  { %s44_s6 = sshll.u32 %s1296_s30, 4  ;;  %s45_s6 = int_to_ptr.vmem [resolvable:$true] %s44_s6 }
  0x19   :  { %s1254_s7 = scalar_lea.vmem %s45_s6, 6144  ;;  %p1259_p11 = scmp.lt.s32.totalorder %s45_s6, %s45_s6 }
  0x1a   :  { %p1255_p10 = scmp.ne.s32.totalorder %s45_s6, %s1254_s7  ;;  %p1260_p12 = scmp.lt.s32.totalorder %s1254_s7, %s1254_s7 }
  0x1c   :  { %p1261_p13 = por %p1260_p12, %p1259_p11 }
  0x1e   :  { %p1262_p0 = pnand %p1261_p13, %p1255_p10 }
  0x20   :  { %1265 = shalt.err (!%p1262_p0)
}
  0x21   :  { %50 = dma.hbm_to_vmem [thread:$0]  %s1522_s3, 6144, %s45_s6, [#allocation8], %s1294_s23, %s1294_s23, %s1295_s24  }
  0x22   :  { %1286 = dma.done.wait [#allocation5], 512  }
  0x23   :  { %1287 = vsyncadd [#allocation5], 4294966784 }
  0x24   :  { %1288 = dma.done.wait [#allocation8], 9216  }
  0x25   :  { %1289 = vsyncadd [#allocation8], 4294958080  ;;  %vm62_vm0 = vcmask 516096   ;;  %v1297_v0 = vmov 0.0   ;;  %vm1298_vm1 = vmmov 0   ;;  %v107_v1 = vld [vmem:[#allocation7 + $0x78] sm:$0xff] }
  0x26   :  { %964 = vmatprep.subr.mxu0 %v1297_v0  ;;  %65 = vst [vmem:[#allocation3] sm:$0x1] %v1297_v0  ;;  %66 = vst [vmem:[#allocation3 + $0x11] sm:$0x1] %v1297_v0  ;;  %995 = vmatprep.subr.mxu1 %v1297_v0  ;;  %v93_v2 = vld [vmem:[#allocation7 + $0x38] sm:$0xff]  ;;  %v106_v3 = vld [vmem:[#allocation7 + $0x70] sm:$0xff] }
  0x27   :  { %74 = vst [vmem:[#allocation3 + $0x12] sm:$0x1] %v1297_v0  ;;  %75 = vst [vmem:[#allocation3 + $0x23] sm:$0x1] %v1297_v0  ;;  %980 = vmatprep.mubr.msk.f32.mxu0 %vm1298_vm1, %v1297_v0  ;;  %1011 = vmatprep.mubr.msk.f32.mxu1 %vm1298_vm1, %v1297_v0  ;;  %v92_v4 = vld [vmem:[#allocation7 + $0x30] sm:$0xff]  ;;  %v105_v5 = vld [vmem:[#allocation7 + $0x68] sm:$0xff] }
  0x28   :  { %63 = vst.msk [vmem:[#allocation2] sm:$0x1] %vm62_vm0, %v1297_v0  ;;  %64 = vst.msk [vmem:[#allocation2 + $0x11] sm:$0x1] %vm62_vm0, %v1297_v0  ;;  %965 = vmatpush3.msra.mxu0 %v107_v1  ;;  %996 = vmatpush3.msra.mxu1 %v93_v2  ;;  %v91_v6 = vld [vmem:[#allocation7 + $0x28] sm:$0xff]  ;;  %vm69_vm2 = vcmask 523264  }
  0x29   :  { %72 = vst.msk [vmem:[#allocation2 + $0x12] sm:$0x1] %vm62_vm0, %v1297_v0  ;;  %73 = vst.msk [vmem:[#allocation2 + $0x23] sm:$0x1] %vm62_vm0, %v1297_v0  ;;  %966 = vmatprep.subr.mxu0 %v1297_v0  ;;  %997 = vmatprep.subr.mxu1 %v1297_v0  ;;  %v104_v7 = vld [vmem:[#allocation7 + $0x60] sm:$0xff]  ;;  %v103_v10 = vld [vmem:[#allocation7 + $0x58] sm:$0xff] }
  0x2a   :  { %967 = vmatpush3.msra.mxu0 %v106_v3  ;;  %998 = vmatpush3.msra.mxu1 %v92_v4  ;;  %v90_v8 = vld [vmem:[#allocation7 + $0x20] sm:$0xff]  ;;  %v89_v11 = vld [vmem:[#allocation7 + $0x18] sm:$0xff]  ;;  %v68_v12 = vld [vmem:[#allocation4 + $0x8] sm:$0xff] }
  0x2b   :  { %968 = vmatprep.subr.mxu0 %v1297_v0  ;;  %999 = vmatprep.subr.mxu1 %v1297_v0  ;;  %v67_v9 = vld [vmem:[#allocation4] sm:$0xff]  ;;  %71 = vst.msk [vmem:[#allocation2 + $0x9] sm:$0xff] %vm69_vm2, %v68_v12  ;;  %v77_v13 = vld [vmem:[#allocation4 + $0x10] sm:$0xff]  ;;  %v78_v16 = vld [vmem:[#allocation4 + $0x18] sm:$0xff] }
  0x2c   :  { %969 = vmatpush3.msra.mxu0 %v105_v5  ;;  %1000 = vmatpush3.msra.mxu1 %v91_v6  ;;  %70 = vst.msk [vmem:[#allocation2 + $0x1] sm:$0xff] %vm69_vm2, %v67_v9  ;;  %v102_v14 = vld [vmem:[#allocation7 + $0x50] sm:$0xff]  ;;  %79 = vst.msk [vmem:[#allocation2 + $0x13] sm:$0xff] %vm69_vm2, %v77_v13  ;;  %v101_v17 = vld [vmem:[#allocation7 + $0x48] sm:$0xff] }
  0x2d   :  { %970 = vmatprep.subr.mxu0 %v1297_v0  ;;  %1001 = vmatprep.subr.mxu1 %v1297_v0  ;;  %v88_v15 = vld [vmem:[#allocation7 + $0x10] sm:$0xff]  ;;  %80 = vst.msk [vmem:[#allocation2 + $0x1b] sm:$0xff] %vm69_vm2, %v78_v16  ;;  %v87_v18 = vld [vmem:[#allocation7 + $0x8] sm:$0xff]  ;;  %v100_v19 = vld [vmem:[#allocation7 + $0x40] sm:$0xff] }
  0x2e   :  { %971 = vmatpush3.msra.mxu0 %v104_v7  ;;  %1002 = vmatpush3.msra.mxu1 %v90_v8  ;;  %v86_v20 = vld [vmem:[#allocation7] sm:$0xff]  ;;  %v331_v23 = vld [vmem:[#allocation7 + $0xb8] sm:$0xff]  ;;  %v330_v24 = vld [vmem:[#allocation7 + $0xb0] sm:$0xff] }
  0x2f   :  { %972 = vmatprep.subr.mxu0 %v1297_v0  ;;  %1003 = vmatprep.subr.mxu1 %v1297_v0  ;;  %v329_v27 = vld [vmem:[#allocation7 + $0xa8] sm:$0xff]  ;;  %v328_v30 = vld [vmem:[#allocation7 + $0xa0] sm:$0xff]  ;;  %v327_v31 = vld [vmem:[#allocation7 + $0x98] sm:$0xff] }
  0x30   :  { %973 = vmatpush3.msra.mxu0 %v103_v10  ;;  %1004 = vmatpush3.msra.mxu1 %v89_v11  ;;  %v326_v34 = vld [vmem:[#allocation7 + $0x90] sm:$0xff]  ;;  %v325_v35 = vld [vmem:[#allocation7 + $0x88] sm:$0xff]  ;;  %v324_v38 = vld [vmem:[#allocation7 + $0x80] sm:$0xff] }
  0x31   :  { %974 = vmatprep.subr.mxu0 %v1297_v0  ;;  %1005 = vmatprep.subr.mxu1 %v1297_v0  ;;  %v506_v44 = vld [vmem:[#allocation9 + $0xf8] sm:$0xff]  ;;  %v505_v45 = vld [vmem:[#allocation9 + $0xf0] sm:$0xff]  ;;  %v504_v46 = vld [vmem:[#allocation9 + $0xe8] sm:$0xff] }
  0x32   :  { %975 = vmatpush3.msra.mxu0 %v102_v14  ;;  %1006 = vmatpush3.msra.mxu1 %v88_v15  ;;  %v95_v25 = vld [vmem:[#allocation2 + $0x9] sm:$0xff]  ;;  %v501_v50 = vld [vmem:[#allocation9 + $0xd0] sm:$0xff]  ;;  %v500_v52 = vld [vmem:[#allocation9 + $0xc8] sm:$0xff] }
  0x33   :  { %976 = vmatprep.subr.mxu0 %v1297_v0  ;;  %1007 = vmatprep.subr.mxu1 %v1297_v0  ;;  %v94_v21 = vld [vmem:[#allocation2 + $0x1] sm:$0xff]  ;;  %v96_v28 = vld [vmem:[#allocation2 + $0x11] sm:$0xff] }
  0x34   :  { %977 = vmatpush3.msra.mxu0 %v101_v17  ;;  %1008 = vmatpush3.msra.mxu1 %v87_v18  ;;  %v81_v22 = vld [vmem:[#allocation2] sm:$0xff]  ;;  %v82_v26 = vld [vmem:[#allocation2 + $0x8] sm:$0xff]  ;;  %v83_v29 = vld [vmem:[#allocation2 + $0x10] sm:$0xff] }
  0x35   :  { %978 = vmatprep.subr.mxu0 %v1297_v0  ;;  %1009 = vmatprep.subr.mxu1 %v1297_v0  ;;  %v97_v32 = vld [vmem:[#allocation2 + $0x19] sm:$0xff]  ;;  %v98_v36 = vld [vmem:[#allocation2 + $0x21] sm:$0x3]  ;;  %v319_v40 = vld [vmem:[#allocation2 + $0xa] sm:$0xff] }
  0x36   :  { %979 = vmatpush3.msra.mxu0 %v100_v19  ;;  %1010 = vmatpush3.msra.mxu1 %v86_v20  ;;  %v84_v33 = vld [vmem:[#allocation2 + $0x18] sm:$0xff]  ;;  %v85_v37 = vld [vmem:[#allocation2 + $0x20] sm:$0x3]  ;;  %v318_v39 = vld [vmem:[#allocation2 + $0x2] sm:$0xff] }
  0x37   :  { %981 = vmatmul.mubr.msk.f32.vlgmr.msra.gmra.mxu0 %vm69_vm2, %v94_v21  ;;  %1026 = vmatprep.subr.mxu0 %v1297_v0  ;;  %v320_v41 = vld [vmem:[#allocation2 + $0x12] sm:$0xff]  ;;  %v321_v42 = vld [vmem:[#allocation2 + $0x1a] sm:$0xff]  ;;  %v322_v43 = vld [vmem:[#allocation2 + $0x22] sm:$0x3] }
  0x38   :  { %1012 = vmatmul.mubr.msk.f32.vlgmr.msra.gmra.mxu1 %vm69_vm2, %v81_v22  ;;  %1027 = vmatpush3.msra.mxu0 %v331_v23  ;;  %v503_v47 = vld [vmem:[#allocation9 + $0xe0] sm:$0xff]  ;;  %v502_v48 = vld [vmem:[#allocation9 + $0xd8] sm:$0xff]  ;;  %v483_v51 = vld [vmem:[#allocation9 + $0x70] sm:$0xff] }
  0x39   :  { %983 = vmatprep.mubr.msk.f32.mxu0 %vm1298_vm1, %v1297_v0  ;;  %1028 = vmatprep.subr.mxu0 %v1297_v0  ;;  %v484_v49 = vld [vmem:[#allocation9 + $0x78] sm:$0xff]  ;;  %v482_v53 = vld [vmem:[#allocation9 + $0x68] sm:$0xff]  ;;  %v499_v54 = vld [vmem:[#allocation9 + $0xc0] sm:$0xff] }
  0x3a   :  { %1014 = vmatprep.mubr.msk.f32.mxu1 %vm1298_vm1, %v1297_v0  ;;  %1029 = vmatpush3.msra.mxu0 %v330_v24  ;;  %v481_v55 = vld [vmem:[#allocation9 + $0x60] sm:$0xff]  ;;  %v498_v56 = vld [vmem:[#allocation9 + $0xb8] sm:$0xff]  ;;  %v497_v58 = vld [vmem:[#allocation9 + $0xb0] sm:$0xff] }
  0x3b   :  { %984 = vmatmul.mubr.msk.f32.gmra.mxu0 %vm69_vm2, %v95_v25  ;;  %1030 = vmatprep.subr.mxu0 %v1297_v0  ;;  %v480_v57 = vld [vmem:[#allocation9 + $0x58] sm:$0xff]  ;;  %v479_v59 = vld [vmem:[#allocation9 + $0x50] sm:$0xff]  ;;  %v496_v60 = vld [vmem:[#allocation9 + $0xa8] sm:$0xff] }
  0x3c   :  { %1015 = vmatmul.mubr.msk.f32.gmra.mxu1 %vm69_vm2, %v82_v26  ;;  %1031 = vmatpush3.msra.mxu0 %v329_v27  ;;  %v478_v61 = vld [vmem:[#allocation9 + $0x48] sm:$0xff]  ;;  %v495_v62 = vld [vmem:[#allocation9 + $0xa0] sm:$0xff]  ;;  %v494_v1 = vld [vmem:[#allocation9 + $0x98] sm:$0xff] }
  0x3d   :  { %986 = vmatprep.mubr.msk.f32.mxu0 %vm1298_vm1, %v1297_v0  ;;  %1017 = vmatprep.mubr.msk.f32.mxu1 %vm1298_vm1, %v1297_v0  ;;  %v477_v63 = vld [vmem:[#allocation9 + $0x40] sm:$0xff]  ;;  %v476_v2 = vld [vmem:[#allocation9 + $0x38] sm:$0xff]  ;;  %v493_v3 = vld [vmem:[#allocation9 + $0x90] sm:$0xff] }
  0x3e   :  { %1032 = vmatprep.subr.mxu0 %v1297_v0  ;;  %1057 = vmatprep.subr.mxu1 %v1297_v0  ;;  %v475_v4 = vld [vmem:[#allocation9 + $0x30] sm:$0xff]  ;;  %v492_v5 = vld [vmem:[#allocation9 + $0x88] sm:$0xff]  ;;  %v491_v7 = vld [vmem:[#allocation9 + $0x80] sm:$0xff] }
  0x3f   :  { %987 = vmatmul.mubr.msk.f32.gmra.mxu0 %vm69_vm2, %v96_v28  ;;  %1058 = vmatpush3.msra.mxu1 %v506_v44  ;;  %v474_v6 = vld [vmem:[#allocation9 + $0x28] sm:$0xff]  ;;  %v473_v8 = vld [vmem:[#allocation9 + $0x20] sm:$0xff]  ;;  %v472_v9 = vld [vmem:[#allocation9 + $0x18] sm:$0xff] }
  0x40   :  { %1018 = vmatmul.mubr.msk.f32.gmra.mxu1 %vm69_vm2, %v83_v29  ;;  %1033 = vmatpush3.msra.mxu0 %v328_v30  ;;  %v471_v10 = vld [vmem:[#allocation9 + $0x10] sm:$0xff]  ;;  %v470_v11 = vld [vmem:[#allocation9 + $0x8] sm:$0xff]  ;;  %v469_v12 = vld [vmem:[#allocation9] sm:$0xff] }
  0x41   :  { %1034 = vmatprep.subr.mxu0 %v1297_v0  ;;  %989 = vmatprep.mubr.msk.f32.mxu0 %vm1298_vm1, %v1297_v0 }
  0x42   :  { %1035 = vmatpush3.msra.mxu0 %v327_v31  ;;  %1020 = vmatprep.mubr.msk.f32.mxu1 %vm1298_vm1, %v1297_v0 }
  0x43   :  { %990 = vmatmul.mubr.msk.f32.gmra.mxu0 %vm69_vm2, %v97_v32  ;;  %1036 = vmatprep.subr.mxu0 %v1297_v0 }
  0x44   :  { %1021 = vmatmul.mubr.msk.f32.gmra.mxu1 %vm69_vm2, %v84_v33  ;;  %1037 = vmatpush3.msra.mxu0 %v326_v34 }
  0x45   :  { %992 = vmatprep.mubr.msk.f32.mxu0 %vm1298_vm1, %v1297_v0  ;;  %1038 = vmatprep.subr.mxu0 %v1297_v0 }
  0x46   :  { %1023 = vmatprep.mubr.msk.f32.mxu1 %vm1298_vm1, %v1297_v0  ;;  %1039 = vmatpush3.msra.mxu0 %v325_v35  ;;  %v860_v35 = vld [vmem:[%s1521_s2] ss:$0 sm:$0xff] }
  0x47   :  { %993 = vmatmul.mubr.msk.f32.gmra.mxu0 %vm69_vm2, %v98_v36  ;;  %1040 = vmatprep.subr.mxu0 %v1297_v0 }
  0x48   :  { %1024 = vmatmul.mubr.msk.f32.gmra.mxu1 %vm69_vm2, %v85_v37  ;;  %1041 = vmatpush3.msra.mxu0 %v324_v38 }
  0x49   :  { %1042 = vmatprep.mubr.msk.f32.mxu0 %vm1298_vm1, %v1297_v0  ;;  %1104 = vmatprep.subr.mxu0 %v1297_v0 }
  0x4a   :  { %1089 = vmatprep.mubr.msk.f32.mxu1 %vm1298_vm1, %v1297_v0  ;;  %1059 = vmatprep.subr.mxu1 %v1297_v0 }
  0x4b   :  { %1043 = vmatmul.mubr.msk.f32.vlgmr.msra.gmra.mxu0 %vm69_vm2, %v318_v39  ;;  %1060 = vmatpush3.msra.mxu1 %v505_v45 }
  0x4c   :  { %1045 = vmatprep.mubr.msk.f32.mxu0 %vm1298_vm1, %v1297_v0  ;;  %1061 = vmatprep.subr.mxu1 %v1297_v0 }
  0x4d   :  { %1062 = vmatpush3.msra.mxu1 %v504_v46  ;;  %1105 = vmatpush3.msra.mxu0 %v484_v49 }
  0x4e   :  { %1063 = vmatprep.subr.mxu1 %v1297_v0  ;;  %1106 = vmatprep.subr.mxu0 %v1297_v0 }
  0x4f   :  { %1046 = vmatmul.mubr.msk.f32.gmra.mxu0 %vm69_vm2, %v319_v40  ;;  %1064 = vmatpush3.msra.mxu1 %v503_v47  ;;  %v707_v47 = vld [vmem:[#allocation9 + $0x170] sm:$0xff] }
  0x50   :  { %1048 = vmatprep.mubr.msk.f32.mxu0 %vm1298_vm1, %v1297_v0  ;;  %1065 = vmatprep.subr.mxu1 %v1297_v0 }
  0x51   :  { %1066 = vmatpush3.msra.mxu1 %v502_v48  ;;  %1107 = vmatpush3.msra.mxu0 %v483_v51  ;;  %v706_v51 = vld [vmem:[#allocation9 + $0x168] sm:$0xff] }
  0x52   :  { %1067 = vmatprep.subr.mxu1 %v1297_v0  ;;  %1108 = vmatprep.subr.mxu0 %v1297_v0 }
  0x53   :  { %1049 = vmatmul.mubr.msk.f32.gmra.mxu0 %vm69_vm2, %v320_v41  ;;  %1068 = vmatpush3.msra.mxu1 %v501_v50 }
  0x54   :  { %1051 = vmatprep.mubr.msk.f32.mxu0 %vm1298_vm1, %v1297_v0  ;;  %1069 = vmatprep.subr.mxu1 %v1297_v0 }
  0x55   :  { %1070 = vmatpush3.msra.mxu1 %v500_v52  ;;  %1109 = vmatpush3.msra.mxu0 %v482_v53 }
  0x56   :  { %1071 = vmatprep.subr.mxu1 %v1297_v0  ;;  %1110 = vmatprep.subr.mxu0 %v1297_v0 }
  0x57   :  { %1052 = vmatmul.mubr.msk.f32.gmra.mxu0 %vm69_vm2, %v321_v42  ;;  %1072 = vmatpush3.msra.mxu1 %v499_v54 }
  0x58   :  { %1054 = vmatprep.mubr.msk.f32.mxu0 %vm1298_vm1, %v1297_v0  ;;  %1111 = vmatpush3.msra.mxu0 %v481_v55  ;;  %v705_v55 = vld [vmem:[#allocation9 + $0x160] sm:$0xff] }
  0x59   :  { %1073 = vmatprep.subr.mxu1 %v1297_v0  ;;  %1112 = vmatprep.subr.mxu0 %v1297_v0 }
  0x5a   :  { %1074 = vmatpush3.msra.mxu1 %v498_v56  ;;  %1113 = vmatpush3.msra.mxu0 %v480_v57 }
  0x5b   :  { %1055 = vmatmul.mubr.msk.f32.gmra.mxu0 %vm69_vm2, %v322_v43  ;;  %1075 = vmatprep.subr.mxu1 %v1297_v0  ;;  %v708_v43 = vld [vmem:[#allocation9 + $0x178] sm:$0xff] }
  0x5c   :  { %1136 = vmatprep.mubr.msk.f32.mxu0 %vm1298_vm1, %v1297_v0  ;;  %1114 = vmatprep.subr.mxu0 %v1297_v0 }
  0x5d   :  { %1076 = vmatpush3.msra.mxu1 %v497_v58  ;;  %1115 = vmatpush3.msra.mxu0 %v479_v59  ;;  %v704_v59 = vld [vmem:[#allocation9 + $0x158] sm:$0xff] }
  0x5e   :  { %1077 = vmatprep.subr.mxu1 %v1297_v0  ;;  %1116 = vmatprep.subr.mxu0 %v1297_v0 }
  0x5f   :  { %1078 = vmatpush3.msra.mxu1 %v496_v60  ;;  %1117 = vmatpush3.msra.mxu0 %v478_v61 }
  0x60   :  { %1079 = vmatprep.subr.mxu1 %v1297_v0  ;;  %1118 = vmatprep.subr.mxu0 %v1297_v0 }
  0x61   :  { %1080 = vmatpush3.msra.mxu1 %v495_v62  ;;  %1119 = vmatpush3.msra.mxu0 %v477_v63 }
  0x62   :  { %1081 = vmatprep.subr.mxu1 %v1297_v0  ;;  %1120 = vmatprep.subr.mxu0 %v1297_v0 }
  0x63   :  { %1082 = vmatpush3.msra.mxu1 %v494_v1  ;;  %1121 = vmatpush3.msra.mxu0 %v476_v2  ;;  %v703_v1 = vld [vmem:[#allocation9 + $0x150] sm:$0xff] }
  0x64   :  { %1083 = vmatprep.subr.mxu1 %v1297_v0  ;;  %1122 = vmatprep.subr.mxu0 %v1297_v0 }
  0x65   :  { %1084 = vmatpush3.msra.mxu1 %v493_v3  ;;  %1123 = vmatpush3.msra.mxu0 %v475_v4 }
  0x66   :  { %1085 = vmatprep.subr.mxu1 %v1297_v0  ;;  %1124 = vmatprep.subr.mxu0 %v1297_v0 }
  0x67   :  { %1086 = vmatpush3.msra.mxu1 %v492_v5  ;;  %1125 = vmatpush3.msra.mxu0 %v474_v6  ;;  %v702_v5 = vld [vmem:[#allocation9 + $0x148] sm:$0xff] }
  0x68   :  { %1087 = vmatprep.subr.mxu1 %v1297_v0  ;;  %1126 = vmatprep.subr.mxu0 %v1297_v0 }
  0x69   :  { %1088 = vmatpush3.msra.mxu1 %v491_v7  ;;  %1127 = vmatpush3.msra.mxu0 %v473_v8 }
  0x6a   :  { %1151 = vmatprep.subr.mxu1 %v1297_v0  ;;  %1128 = vmatprep.subr.mxu0 %v1297_v0 }
  0x6b   :  { %1129 = vmatpush3.msra.mxu0 %v472_v9  ;;  %v701_v9 = vld [vmem:[#allocation9 + $0x140] sm:$0xff] }
  0x6c   :  { %1130 = vmatprep.subr.mxu0 %v1297_v0 }
  0x6d   :  { %1131 = vmatpush3.msra.mxu0 %v471_v10 }
  0x6e   :  { %1132 = vmatprep.subr.mxu0 %v1297_v0 }
  0x6f   :  { %1133 = vmatpush3.msra.mxu0 %v470_v11 }
  0x70   :  { %1134 = vmatprep.subr.mxu0 %v1297_v0 }
  0x71   :  { %1135 = vmatpush3.msra.mxu0 %v469_v12 }
  0xf7   :  { %v189_v13 = vpop.f32.mrf.mxu0 }
  0xf8   :  { %v294_v14 = vpop.f32.mrf.mxu1 }
  0xf9   :  { %v982_v15 = vpop.f32.mrf.mxu0  ;;  %v295_v32 = vadd.f32 %v294_v14, %v189_v13  ;;  %v700_v13 = vld [vmem:[#allocation9 + $0x138] sm:$0xff] }
  0xfa   :  { %v1013_v16 = vpop.f32.mrf.mxu1  ;;  %v699_v15 = vld [vmem:[#allocation9 + $0x130] sm:$0xff] }
  0xfb   :  { %v194_v17 = vpop.f32.mrf.mxu0 }
  0xfc   :  { %v299_v18 = vpop.f32.mrf.mxu1 }
  0xfd   :  { %v985_v19 = vpop.f32.mrf.mxu0  ;;  %v300_v38 = vadd.f32 %v299_v18, %v194_v17  ;;  %v698_v18 = vld [vmem:[#allocation9 + $0x128] sm:$0xff] }
  0xfe   :  { %v1016_v20 = vpop.f32.mrf.mxu1  ;;  %v697_v19 = vld [vmem:[#allocation9 + $0x120] sm:$0xff] }
  0xff   :  { %v199_v21 = vpop.f32.mrf.mxu0  ;;  %v696_v20 = vld [vmem:[#allocation9 + $0x118] sm:$0xff] }
 0x100   :  { %v304_v22 = vpop.f32.mrf.mxu1 }
 0x101   :  { %v988_v23 = vpop.f32.mrf.mxu0  ;;  %v305_v45 = vadd.f32 %v304_v22, %v199_v21  ;;  %v695_v21 = vld [vmem:[#allocation9 + $0x110] sm:$0xff]  ;;  %v694_v22 = vld [vmem:[#allocation9 + $0x108] sm:$0xff] }
 0x102   :  { %v1019_v24 = vpop.f32.mrf.mxu1  ;;  %v693_v23 = vld [vmem:[#allocation9 + $0x100] sm:$0xff] }
 0x103   :  { %v204_v25 = vpop.f32.mrf.mxu0 }
 0x104   :  { %v309_v26 = vpop.f32.mrf.mxu1 }
 0x105   :  { %v991_v27 = vpop.f32.mrf.mxu0  ;;  %v310_v53 = vadd.f32 %v309_v26, %v204_v25 }
 0x106   :  { %v1022_v28 = vpop.f32.mrf.mxu1 }
 0x107   :  { %v209_v29 = vpop.f32.mrf.mxu0 }
 0x108   :  { %v314_v30 = vpop.f32.mrf.mxu1 }
 0x109   :  { %v994_v31 = vpop.f32.mrf.mxu0  ;;  %v315_v62 = vadd.f32 %v314_v30, %v209_v29 }
 0x10a   :  { %v1025_v33 = vpop.f32.mrf.mxu1 }
 0x10b   :  { %v413_v34 = vpop.f32.mrf.mxu0 }
 0x10c   :  { %v437_v36 = vadd.f32 %v413_v34, %v295_v32 }
 0x10d   :  { %v1044_v37 = vpop.f32.mrf.mxu0 }
 0x10e   :  { %v449_v39 = vadd.f32 %v860_v35, %v437_v36 }
 0x10f   :  { %v418_v40 = vpop.f32.mrf.mxu0 }
 0x110   :  { %v454_v41 = vmax.f32 %v449_v39, 0.0  ;;  %v438_v42 = vadd.f32 %v418_v40, %v300_v38 }
 0x111   :  { %v1047_v44 = vpop.f32.mrf.mxu0 }
 0x112   :  { %459 = vst [vmem:[#allocation3 + $0x1] sm:$0xff] %v454_v41  ;;  %v450_v46 = vadd.f32 %v860_v35, %v438_v42  ;;  %1090 = vmatmul.mubr.f32.vlgmr.msra.gmra.mxu1 %v454_v41 }
 0x113   :  { %v423_v48 = vpop.f32.mrf.mxu0  ;;  %1152 = vmatpush3.msra.mxu1 %v708_v43  ;;  %1092 = vmatprep.mubr.msk.f32.mxu1 %vm1298_vm1, %v1297_v0 }
 0x114   :  { %v455_v49 = vmax.f32 %v450_v46, 0.0  ;;  %v439_v50 = vadd.f32 %v423_v48, %v305_v45  ;;  %1153 = vmatprep.subr.mxu1 %v1297_v0 }
 0x115   :  { %v1050_v52 = vpop.f32.mrf.mxu0  ;;  %1154 = vmatpush3.msra.mxu1 %v707_v47 }
 0x116   :  { %460 = vst [vmem:[#allocation3 + $0x9] sm:$0xff] %v455_v49  ;;  %v451_v54 = vadd.f32 %v860_v35, %v439_v50  ;;  %1155 = vmatprep.subr.mxu1 %v1297_v0  ;;  %1093 = vmatmul.mubr.f32.gmra.mxu1 %v455_v49  ;;  %v861_v50 = vld [vmem:[%s1523_s4] ss:$0 sm:$0xff]  ;;  %s1299_s4 = smov [#allocation10]  }
 0x117   :  { %v428_v56 = vpop.f32.mrf.mxu0  ;;  %1156 = vmatpush3.msra.mxu1 %v706_v51  ;;  %1095 = vmatprep.mubr.msk.f32.mxu1 %vm1298_vm1, %v1297_v0  ;;  %s832_s10 = sshll.u32 %s1299_s4, 4  ;;  %s833_s10 = int_to_ptr.vmem [resolvable:$true] %s832_s10 }
 0x118   :  { %v456_v57 = vmax.f32 %v451_v54, 0.0  ;;  %v440_v58 = vadd.f32 %v428_v56, %v310_v53  ;;  %1157 = vmatprep.subr.mxu1 %v1297_v0  ;;  %s1266_s11 = scalar_lea.vmem %s833_s10, 512  ;;  %p1271_p2 = scmp.lt.s32.totalorder %s833_s10, %s833_s10 }
 0x119   :  { %v1053_v60 = vpop.f32.mrf.mxu0  ;;  %v464_v61 = vld [vmem:[#allocation3] sm:$0xff]  ;;  %1158 = vmatpush3.msra.mxu1 %v705_v55  ;;  %p1267_p1 = scmp.ne.s32.totalorder %s833_s10, %s1266_s11  ;;  %p1272_p3 = scmp.lt.s32.totalorder %s1266_s11, %s1266_s11 }
 0x11a   :  { %461 = vst [vmem:[#allocation3 + $0x11] sm:$0xfc] %v456_v57  ;;  %v452_v63 = vadd.f32 %v860_v35, %v440_v58  ;;  %1137 = vmatmul.mubr.f32.vlgmr.msra.gmra.mxu0 %v464_v61  ;;  %1159 = vmatprep.subr.mxu1 %v1297_v0 }
 0x11b   :  { %v433_v2 = vpop.f32.mrf.mxu0  ;;  %1139 = vmatprep.mubr.msk.f32.mxu0 %vm1298_vm1, %v1297_v0  ;;  %1160 = vmatpush3.msra.mxu1 %v704_v59  ;;  %p1273_p4 = por %p1272_p3, %p1271_p2 }
 0x11c   :  { %v457_v3 = vmax.f32 %v452_v63, 0.0  ;;  %v441_v4 = vadd.f32 %v433_v2, %v315_v62  ;;  %1161 = vmatprep.subr.mxu1 %v1297_v0 }
 0x11d   :  { %v465_v6 = vld [vmem:[#allocation3 + $0x8] sm:$0xff]  ;;  %1162 = vmatpush3.msra.mxu1 %v703_v1  ;;  %v1056_v7 = vpop.f32.mrf.mxu0  ;;  %p1274_p5 = pnand %p1273_p4, %p1267_p1 }
 0x11e   :  { %462 = vst [vmem:[#allocation3 + $0x19] sm:$0xff] %v457_v3  ;;  %v453_v8 = vadd.f32 %v860_v35, %v441_v4  ;;  %1140 = vmatmul.mubr.f32.gmra.mxu0 %v465_v6  ;;  %1163 = vmatprep.subr.mxu1 %v1297_v0  ;;  %v687_v24 = vld [vmem:[#allocation3 + $0x2] sm:$0xff]  ;;  %v688_v25 = vld [vmem:[#allocation3 + $0xa] sm:$0xff] }
 0x11f   :  { %1142 = vmatprep.mubr.msk.f32.mxu0 %vm1298_vm1, %v1297_v0  ;;  %1164 = vmatpush3.msra.mxu1 %v702_v5 }
 0x120   :  { %v458_v10 = vmax.f32 %v453_v8, 0.0  ;;  %1165 = vmatprep.subr.mxu1 %v1297_v0 }
 0x121   :  { %v487_v11 = vld [vmem:[#allocation3 + $0x11] sm:$0xff]  ;;  %1166 = vmatpush3.msra.mxu1 %v701_v9 }
 0x122   :  { %v466_v12 = vld [vmem:[#allocation3 + $0x10] sm:$0xff]  ;;  %463 = vst [vmem:[#allocation3 + $0x21] sm:$0x3] %v458_v10  ;;  %1096 = vmatmul.mubr.f32.gmra.mxu1 %v487_v11  ;;  %1167 = vmatprep.subr.mxu1 %v1297_v0 }
 0x123   :  { %1143 = vmatmul.mubr.f32.gmra.mxu0 %v466_v12  ;;  %1098 = vmatprep.mubr.msk.f32.mxu1 %vm1298_vm1, %v1297_v0 }
 0x124   :  { %1145 = vmatprep.mubr.msk.f32.mxu0 %vm1298_vm1, %v1297_v0  ;;  %1168 = vmatpush3.msra.mxu1 %v700_v13 }
 0x125   :  { %v467_v14 = vld [vmem:[#allocation3 + $0x18] sm:$0xff]  ;;  %1169 = vmatprep.subr.mxu1 %v1297_v0 }
 0x126   :  { %1099 = vmatmul.mubr.f32.gmra.mxu1 %v457_v3  ;;  %v689_v26 = vld [vmem:[#allocation3 + $0x12] sm:$0xff] }
 0x127   :  { %1146 = vmatmul.mubr.f32.gmra.mxu0 %v467_v14  ;;  %1101 = vmatprep.mubr.msk.f32.mxu1 %vm1298_vm1, %v1297_v0 }
 0x128   :  { %1148 = vmatprep.mubr.msk.f32.mxu0 %vm1298_vm1, %v1297_v0  ;;  %1170 = vmatpush3.msra.mxu1 %v699_v15 }
 0x129   :  { %v489_v16 = vld [vmem:[#allocation3 + $0x21] sm:$0x3]  ;;  %1171 = vmatprep.subr.mxu1 %v1297_v0 }
 0x12a   :  { %v468_v17 = vld [vmem:[#allocation3 + $0x20] sm:$0x3]  ;;  %1102 = vmatmul.mubr.f32.gmra.mxu1 %v489_v16  ;;  %v691_v28 = vld [vmem:[#allocation3 + $0x22] sm:$0x3] }
 0x12b   :  { %1149 = vmatmul.mubr.f32.gmra.mxu0 %v468_v17  ;;  %1183 = vmatprep.mubr.msk.f32.mxu1 %vm1298_vm1, %v1297_v0  ;;  %v690_v27 = vld [vmem:[#allocation3 + $0x1a] sm:$0xff] }
 0x12c   :  { %1172 = vmatpush3.msra.mxu1 %v698_v18 }
 0x12d   :  { %1173 = vmatprep.subr.mxu1 %v1297_v0 }
 0x12e   :  { %1174 = vmatpush3.msra.mxu1 %v697_v19 }
 0x12f   :  { %1175 = vmatprep.subr.mxu1 %v1297_v0 }
 0x130   :  { %1176 = vmatpush3.msra.mxu1 %v696_v20 }
 0x131   :  { %1177 = vmatprep.subr.mxu1 %v1297_v0 }
 0x132   :  { %1178 = vmatpush3.msra.mxu1 %v695_v21 }
 0x133   :  { %1179 = vmatprep.subr.mxu1 %v1297_v0 }
 0x134   :  { %1180 = vmatpush3.msra.mxu1 %v694_v22 }
 0x135   :  { %1181 = vmatprep.subr.mxu1 %v1297_v0 }
 0x136   :  { %1182 = vmatpush3.msra.mxu1 %v693_v23 }
 0x137   :  { %1184 = vmatmul.mubr.f32.vlgmr.msra.gmra.mxu1 %v687_v24 }
 0x138   :  { %1186 = vmatprep.mubr.msk.f32.mxu1 %vm1298_vm1, %v1297_v0 }
 0x13b   :  { %1187 = vmatmul.mubr.f32.gmra.mxu1 %v688_v25 }
 0x13c   :  { %1189 = vmatprep.mubr.msk.f32.mxu1 %vm1298_vm1, %v1297_v0 }
 0x13f   :  { %1190 = vmatmul.mubr.f32.gmra.mxu1 %v689_v26 }
 0x140   :  { %1192 = vmatprep.mubr.msk.f32.mxu1 %vm1298_vm1, %v1297_v0 }
 0x143   :  { %1193 = vmatmul.mubr.f32.gmra.mxu1 %v690_v27 }
 0x144   :  { %1195 = vmatprep.mubr.msk.f32.mxu1 %vm1298_vm1, %v1297_v0 }
 0x147   :  { %1196 = vmatmul.mubr.f32.gmra.mxu1 %v691_v28 }
 0x1d2   :  { %v573_v29 = vpop.f32.mrf.mxu1 }
 0x1d4   :  { %v1091_v30 = vpop.f32.mrf.mxu1 }
 0x1d6   :  { %v578_v31 = vpop.f32.mrf.mxu1 }
 0x1d8   :  { %v1094_v32 = vpop.f32.mrf.mxu1 }
 0x1da   :  { %v663_v33 = vpop.f32.mrf.mxu0 }
 0x1db   :  { %v664_v48 = vadd.f32 %v663_v33, %v573_v29 }
 0x1dc   :  { %v1138_v34 = vpop.f32.mrf.mxu0 }
 0x1de   :  { %v668_v35 = vpop.f32.mrf.mxu0 }
 0x1df   :  { %v669_v53 = vadd.f32 %v668_v35, %v578_v31 }
 0x1e0   :  { %v1141_v36 = vpop.f32.mrf.mxu0 }
 0x1e2   :  { %v583_v37 = vpop.f32.mrf.mxu1 }
 0x1e3   :  { %v673_v38 = vpop.f32.mrf.mxu0 }
 0x1e4   :  { %v1097_v39 = vpop.f32.mrf.mxu1  ;;  %v674_v59 = vadd.f32 %v673_v38, %v583_v37 }
 0x1e5   :  { %v1144_v40 = vpop.f32.mrf.mxu0 }
 0x1e6   :  { %v588_v41 = vpop.f32.mrf.mxu1 }
 0x1e7   :  { %v678_v42 = vpop.f32.mrf.mxu0 }
 0x1e8   :  { %v1100_v43 = vpop.f32.mrf.mxu1  ;;  %v679_v2 = vadd.f32 %v678_v42, %v588_v41 }
 0x1e9   :  { %v1147_v44 = vpop.f32.mrf.mxu0 }
 0x1ea   :  { %v593_v45 = vpop.f32.mrf.mxu1 }
 0x1eb   :  { %v683_v0 = vpop.f32.mrf.mxu0 }
 0x1ec   :  { %v1103_v46 = vpop.f32.mrf.mxu1  ;;  %v684_v8 = vadd.f32 %v683_v0, %v593_v45 }
 0x1ed   :  { %v1150_v47 = vpop.f32.mrf.mxu0 }
 0x1f7   :  { %v775_v49 = vpop.f32.mrf.mxu1 }
 0x1f8   :  { %v799_v51 = vadd.f32 %v775_v49, %v664_v48 }
 0x1f9   :  { %v1185_v52 = vpop.f32.mrf.mxu1 }
 0x1fa   :  { %v811_v54 = vadd.f32 %v861_v50, %v799_v51 }
 0x1fb   :  { %v780_v55 = vpop.f32.mrf.mxu1 }
 0x1fc   :  { %v816_v56 = vmax.f32 %v811_v54, 0.0  ;;  %v800_v57 = vadd.f32 %v780_v55, %v669_v53 }
 0x1fd   :  { %v1188_v58 = vpop.f32.mrf.mxu1 }
 0x1fe   :  { %821 = vst [vmem:[#allocation10] sm:$0xff] %v816_v56  ;;  %v812_v60 = vadd.f32 %v861_v50, %v800_v57 }
 0x1ff   :  { %v785_v61 = vpop.f32.mrf.mxu1 }
 0x200   :  { %v817_v62 = vmax.f32 %v812_v60, 0.0  ;;  %v801_v63 = vadd.f32 %v785_v61, %v674_v59 }
 0x201   :  { %v1191_v1 = vpop.f32.mrf.mxu1 }
 0x202   :  { %822 = vst [vmem:[#allocation10 + $0x8] sm:$0xff] %v817_v62  ;;  %v813_v3 = vadd.f32 %v861_v50, %v801_v63 }
 0x203   :  { %v790_v4 = vpop.f32.mrf.mxu1 }
 0x204   :  { %v818_v5 = vmax.f32 %v813_v3, 0.0  ;;  %v802_v6 = vadd.f32 %v790_v4, %v679_v2 }
 0x205   :  { %v1194_v7 = vpop.f32.mrf.mxu1 }
 0x206   :  { %824 = vst [vmem:[#allocation10 + $0xe] sm:$0xfc] %v818_v5  ;;  %v814_v9 = vadd.f32 %v861_v50, %v802_v6 }
 0x207   :  { %v795_v10 = vpop.f32.mrf.mxu1 }
 0x208   :  { %v819_v11 = vmax.f32 %v814_v9, 0.0  ;;  %v803_v12 = vadd.f32 %v795_v10, %v684_v8 }
 0x209   :  { %v1197_v13 = vpop.f32.mrf.mxu1 }
 0x20a   :  { %825 = vst [vmem:[#allocation10 + $0x16] sm:$0xff] %v819_v11  ;;  %v815_v14 = vadd.f32 %v861_v50, %v803_v12 }
 0x20c   :  { %v820_v15 = vmax.f32 %v815_v14, 0.0 }
 0x20e   :  { %826 = vst [vmem:[#allocation10 + $0x1e] sm:$0x3] %v820_v15 }
 0x20f   :  { %1277 = shalt.err (!%p1274_p5)
}
 0x210   :  { %838 = dma.vmem_to_hbm [thread:$0]  %s833_s10, 512, %s1524_s5, [#allocation6], %s1294_s23, %s1294_s23, %s1295_s24  }
 0x211   :  { %1290 = dma.done.wait [#allocation6], 512  }
 0x212   :  { %1291 = vsyncadd [#allocation6], 4294966784 }
 0x213   :  { %842 = vsyncpa [#allocation5], 1 }
 0x214   :  { %843 = vsyncpa [#allocation8], 1 }
 0x215   :  { %844 = vsyncpa [#allocation6], 1 }

// kernel: tpu_custom_call.1
= control target key start
LH: loop header
LB: loop body
LE: loop exit
PB: predicated region body
PF: predicated region fallthrough
CT: control target
= control target key end

     0   :  { %10 = vsyncpa [#allocation5], 0  ;;  %s1519_s0 = inlined_call_operand.hbm [shape: f32[2,16,64], index: 0, kind: input, shape index: {}]   ;;  %s1520_s1 = inlined_call_operand.hbm [shape: f32[3,64,128], index: 1, kind: input, shape index: {}]   ;;  %s1521_s2 = inlined_call_operand.vmem [shape: f32[1,128], index: 2, kind: input, shape index: {}]   ;;  %s1522_s3 = inlined_call_operand.hbm [shape: f32[3,128,128], index: 3, kind: input, shape index: {}]   ;;  %s1523_s4 = inlined_call_operand.vmem [shape: f32[1,128], index: 4, kind: input, shape index: {}]   ;;  %s1524_s5 = inlined_call_operand.hbm [shape: f32[2,16,128], index: 5, kind: output, shape index: {}]  }
   0x1   :  { %11 = vsyncpa [#allocation8], 0 }
   0x2   :  { %12 = vsyncpa [#allocation6], 0  ;;  %s1292_s18 = smov [#allocation7]   ;;  %s1293_s20 = smov [#allocation4]  }
   0x3   :  { %s30_s19 = sshll.u32 %s1292_s18, 4  ;;  %s18_s21 = sshll.u32 %s1293_s20, 4  ;;  %s31_s19 = int_to_ptr.vmem [resolvable:$true] %s30_s19  ;;  %s19_s21 = int_to_ptr.vmem [resolvable:$true] %s18_s21 }
   0x4   :  { %s1214_s22 = scalar_lea.vmem %s31_s19, 3072  ;;  %p1219_p1 = scmp.lt.s32.totalorder %s31_s19, %s31_s19 }
   0x5   :  { %p1215_p0 = scmp.ne.s32.totalorder %s31_s19, %s1214_s22  ;;  %p1220_p2 = scmp.lt.s32.totalorder %s1214_s22, %s1214_s22 }
   0x7   :  { %p1221_p3 = por %p1220_p2, %p1219_p1 }
   0x9   :  { %p1222_p4 = pnand %p1221_p3, %p1215_p0 }
   0xb   :  { %1225 = shalt.err (!%p1222_p4)
}
   0xc   :  { %s1294_s23 = smov 128   ;;  %s1295_s24 = smov 8  }
   0xd   :  { %36 = dma.hbm_to_vmem [thread:$0]  %s1520_s1, 3072, %s31_s19, [#allocation8], %s1294_s23, %s1294_s23, %s1295_s24  }
   0xe   :  { %s1234_s27 = scalar_lea.vmem %s19_s21, 512  ;;  %p1239_p6 = scmp.lt.s32.totalorder %s19_s21, %s19_s21 }
   0xf   :  { %p1235_p5 = scmp.ne.s32.totalorder %s19_s21, %s1234_s27  ;;  %p1240_p7 = scmp.lt.s32.totalorder %s1234_s27, %s1234_s27 }
  0x11   :  { %p1241_p8 = por %p1240_p7, %p1239_p6 }
  0x13   :  { %p1242_p9 = pnand %p1241_p8, %p1235_p5 }
  0x15   :  { %1245 = shalt.err (!%p1242_p9)
}
  0x16   :  { %24 = dma.hbm_to_vmem [thread:$0]  %s1519_s0, 512, %s19_s21, [#allocation5], %s1294_s23, %s1294_s23, %s1295_s24  }
  0x17   :  { %s1296_s30 = smov [#allocation9]  }
  0x18   :  { %s44_s6 = sshll.u32 %s1296_s30, 4  ;;  %s45_s6 = int_to_ptr.vmem [resolvable:$true] %s44_s6 }
  0x19   :  { %s1254_s7 = scalar_lea.vmem %s45_s6, 6144  ;;  %p1259_p11 = scmp.lt.s32.totalorder %s45_s6, %s45_s6 }
  0x1a   :  { %p1255_p10 = scmp.ne.s32.totalorder %s45_s6, %s1254_s7  ;;  %p1260_p12 = scmp.lt.s32.totalorder %s1254_s7, %s1254_s7 }
  0x1c   :  { %p1261_p13 = por %p1260_p12, %p1259_p11 }
  0x1e   :  { %p1262_p0 = pnand %p1261_p13, %p1255_p10 }
  0x20   :  { %1265 = shalt.err (!%p1262_p0)
}
  0x21   :  { %50 = dma.hbm_to_vmem [thread:$0]  %s1522_s3, 6144, %s45_s6, [#allocation8], %s1294_s23, %s1294_s23, %s1295_s24  }
  0x22   :  { %1286 = dma.done.wait [#allocation5], 512  }
  0x23   :  { %1287 = vsyncadd [#allocation5], 4294966784 }
  0x24   :  { %1288 = dma.done.wait [#allocation8], 9216  }
  0x25   :  { %1289 = vsyncadd [#allocation8], 4294958080  ;;  %vm62_vm0 = vcmask 516096   ;;  %v1297_v0 = vmov 0.0   ;;  %vm1298_vm1 = vmmov 0   ;;  %v107_v1 = vld [vmem:[#allocation7 + $0x78] sm:$0xff] }
  0x26   :  { %964 = vmatprep.subr.mxu0 %v1297_v0  ;;  %65 = vst [vmem:[#allocation3] sm:$0x1] %v1297_v0  ;;  %66 = vst [vmem:[#allocation3 + $0x11] sm:$0x1] %v1297_v0  ;;  %995 = vmatprep.subr.mxu1 %v1297_v0  ;;  %v93_v2 = vld [vmem:[#allocation7 + $0x38] sm:$0xff]  ;;  %v106_v3 = vld [vmem:[#allocation7 + $0x70] sm:$0xff] }
  0x27   :  { %74 = vst [vmem:[#allocation3 + $0x12] sm:$0x1] %v1297_v0  ;;  %75 = vst [vmem:[#allocation3 + $0x23] sm:$0x1] %v1297_v0  ;;  %980 = vmatprep.mubr.msk.f32.mxu0 %vm1298_vm1, %v1297_v0  ;;  %1011 = vmatprep.mubr.msk.f32.mxu1 %vm1298_vm1, %v1297_v0  ;;  %v92_v4 = vld [vmem:[#allocation7 + $0x30] sm:$0xff]  ;;  %v105_v5 = vld [vmem:[#allocation7 + $0x68] sm:$0xff] }
  0x28   :  { %63 = vst.msk [vmem:[#allocation2] sm:$0x1] %vm62_vm0, %v1297_v0  ;;  %64 = vst.msk [vmem:[#allocation2 + $0x11] sm:$0x1] %vm62_vm0, %v1297_v0  ;;  %965 = vmatpush3.msra.mxu0 %v107_v1  ;;  %996 = vmatpush3.msra.mxu1 %v93_v2  ;;  %v91_v6 = vld [vmem:[#allocation7 + $0x28] sm:$0xff]  ;;  %vm69_vm2 = vcmask 523264  }
  0x29   :  { %72 = vst.msk [vmem:[#allocation2 + $0x12] sm:$0x1] %vm62_vm0, %v1297_v0  ;;  %73 = vst.msk [vmem:[#allocation2 + $0x23] sm:$0x1] %vm62_vm0, %v1297_v0  ;;  %966 = vmatprep.subr.mxu0 %v1297_v0  ;;  %997 = vmatprep.subr.mxu1 %v1297_v0  ;;  %v104_v7 = vld [vmem:[#allocation7 + $0x60] sm:$0xff]  ;;  %v103_v10 = vld [vmem:[#allocation7 + $0x58] sm:$0xff] }
  0x2a   :  { %967 = vmatpush3.msra.mxu0 %v106_v3  ;;  %998 = vmatpush3.msra.mxu1 %v92_v4  ;;  %v90_v8 = vld [vmem:[#allocation7 + $0x20] sm:$0xff]  ;;  %v89_v11 = vld [vmem:[#allocation7 + $0x18] sm:$0xff]  ;;  %v68_v12 = vld [vmem:[#allocation4 + $0x8] sm:$0xff] }
  0x2b   :  { %968 = vmatprep.subr.mxu0 %v1297_v0  ;;  %999 = vmatprep.subr.mxu1 %v1297_v0  ;;  %v67_v9 = vld [vmem:[#allocation4] sm:$0xff]  ;;  %71 = vst.msk [vmem:[#allocation2 + $0x9] sm:$0xff] %vm69_vm2, %v68_v12  ;;  %v77_v13 = vld [vmem:[#allocation4 + $0x10] sm:$0xff]  ;;  %v78_v16 = vld [vmem:[#allocation4 + $0x18] sm:$0xff] }
  0x2c   :  { %969 = vmatpush3.msra.mxu0 %v105_v5  ;;  %1000 = vmatpush3.msra.mxu1 %v91_v6  ;;  %70 = vst.msk [vmem:[#allocation2 + $0x1] sm:$0xff] %vm69_vm2, %v67_v9  ;;  %v102_v14 = vld [vmem:[#allocation7 + $0x50] sm:$0xff]  ;;  %79 = vst.msk [vmem:[#allocation2 + $0x13] sm:$0xff] %vm69_vm2, %v77_v13  ;;  %v101_v17 = vld [vmem:[#allocation7 + $0x48] sm:$0xff] }
  0x2d   :  { %970 = vmatprep.subr.mxu0 %v1297_v0  ;;  %1001 = vmatprep.subr.mxu1 %v1297_v0  ;;  %v88_v15 = vld [vmem:[#allocation7 + $0x10] sm:$0xff]  ;;  %80 = vst.msk [vmem:[#allocation2 + $0x1b] sm:$0xff] %vm69_vm2, %v78_v16  ;;  %v87_v18 = vld [vmem:[#allocation7 + $0x8] sm:$0xff]  ;;  %v100_v19 = vld [vmem:[#allocation7 + $0x40] sm:$0xff] }
  0x2e   :  { %971 = vmatpush3.msra.mxu0 %v104_v7  ;;  %1002 = vmatpush3.msra.mxu1 %v90_v8  ;;  %v86_v20 = vld [vmem:[#allocation7] sm:$0xff]  ;;  %v331_v23 = vld [vmem:[#allocation7 + $0xb8] sm:$0xff]  ;;  %v330_v24 = vld [vmem:[#allocation7 + $0xb0] sm:$0xff] }
  0x2f   :  { %972 = vmatprep.subr.mxu0 %v1297_v0  ;;  %1003 = vmatprep.subr.mxu1 %v1297_v0  ;;  %v329_v27 = vld [vmem:[#allocation7 + $0xa8] sm:$0xff]  ;;  %v328_v30 = vld [vmem:[#allocation7 + $0xa0] sm:$0xff]  ;;  %v327_v31 = vld [vmem:[#allocation7 + $0x98] sm:$0xff] }
  0x30   :  { %973 = vmatpush3.msra.mxu0 %v103_v10  ;;  %1004 = vmatpush3.msra.mxu1 %v89_v11  ;;  %v326_v34 = vld [vmem:[#allocation7 + $0x90] sm:$0xff]  ;;  %v325_v35 = vld [vmem:[#allocation7 + $0x88] sm:$0xff]  ;;  %v324_v38 = vld [vmem:[#allocation7 + $0x80] sm:$0xff] }
  0x31   :  { %974 = vmatprep.subr.mxu0 %v1297_v0  ;;  %1005 = vmatprep.subr.mxu1 %v1297_v0  ;;  %v506_v44 = vld [vmem:[#allocation9 + $0xf8] sm:$0xff]  ;;  %v505_v45 = vld [vmem:[#allocation9 + $0xf0] sm:$0xff]  ;;  %v504_v46 = vld [vmem:[#allocation9 + $0xe8] sm:$0xff] }
  0x32   :  { %975 = vmatpush3.msra.mxu0 %v102_v14  ;;  %1006 = vmatpush3.msra.mxu1 %v88_v15  ;;  %v95_v25 = vld [vmem:[#allocation2 + $0x9] sm:$0xff]  ;;  %v501_v50 = vld [vmem:[#allocation9 + $0xd0] sm:$0xff]  ;;  %v500_v52 = vld [vmem:[#allocation9 + $0xc8] sm:$0xff] }
  0x33   :  { %976 = vmatprep.subr.mxu0 %v1297_v0  ;;  %1007 = vmatprep.subr.mxu1 %v1297_v0  ;;  %v94_v21 = vld [vmem:[#allocation2 + $0x1] sm:$0xff]  ;;  %v96_v28 = vld [vmem:[#allocation2 + $0x11] sm:$0xff] }
  0x34   :  { %977 = vmatpush3.msra.mxu0 %v101_v17  ;;  %1008 = vmatpush3.msra.mxu1 %v87_v18  ;;  %v81_v22 = vld [vmem:[#allocation2] sm:$0xff]  ;;  %v82_v26 = vld [vmem:[#allocation2 + $0x8] sm:$0xff]  ;;  %v83_v29 = vld [vmem:[#allocation2 + $0x10] sm:$0xff] }
  0x35   :  { %978 = vmatprep.subr.mxu0 %v1297_v0  ;;  %1009 = vmatprep.subr.mxu1 %v1297_v0  ;;  %v97_v32 = vld [vmem:[#allocation2 + $0x19] sm:$0xff]  ;;  %v98_v36 = vld [vmem:[#allocation2 + $0x21] sm:$0x3]  ;;  %v319_v40 = vld [vmem:[#allocation2 + $0xa] sm:$0xff] }
  0x36   :  { %979 = vmatpush3.msra.mxu0 %v100_v19  ;;  %1010 = vmatpush3.msra.mxu1 %v86_v20  ;;  %v84_v33 = vld [vmem:[#allocation2 + $0x18] sm:$0xff]  ;;  %v85_v37 = vld [vmem:[#allocation2 + $0x20] sm:$0x3]  ;;  %v318_v39 = vld [vmem:[#allocation2 + $0x2] sm:$0xff] }
  0x37   :  { %981 = vmatmul.mubr.msk.f32.vlgmr.msra.gmra.mxu0 %vm69_vm2, %v94_v21  ;;  %1026 = vmatprep.subr.mxu0 %v1297_v0  ;;  %v320_v41 = vld [vmem:[#allocation2 + $0x12] sm:$0xff]  ;;  %v321_v42 = vld [vmem:[#allocation2 + $0x1a] sm:$0xff]  ;;  %v322_v43 = vld [vmem:[#allocation2 + $0x22] sm:$0x3] }
  0x38   :  { %1012 = vmatmul.mubr.msk.f32.vlgmr.msra.gmra.mxu1 %vm69_vm2, %v81_v22  ;;  %1027 = vmatpush3.msra.mxu0 %v331_v23  ;;  %v503_v47 = vld [vmem:[#allocation9 + $0xe0] sm:$0xff]  ;;  %v502_v48 = vld [vmem:[#allocation9 + $0xd8] sm:$0xff]  ;;  %v483_v51 = vld [vmem:[#allocation9 + $0x70] sm:$0xff] }
  0x39   :  { %983 = vmatprep.mubr.msk.f32.mxu0 %vm1298_vm1, %v1297_v0  ;;  %1028 = vmatprep.subr.mxu0 %v1297_v0  ;;  %v484_v49 = vld [vmem:[#allocation9 + $0x78] sm:$0xff]  ;;  %v482_v53 = vld [vmem:[#allocation9 + $0x68] sm:$0xff]  ;;  %v499_v54 = vld [vmem:[#allocation9 + $0xc0] sm:$0xff] }
  0x3a   :  { %1014 = vmatprep.mubr.msk.f32.mxu1 %vm1298_vm1, %v1297_v0  ;;  %1029 = vmatpush3.msra.mxu0 %v330_v24  ;;  %v481_v55 = vld [vmem:[#allocation9 + $0x60] sm:$0xff]  ;;  %v498_v56 = vld [vmem:[#allocation9 + $0xb8] sm:$0xff]  ;;  %v497_v58 = vld [vmem:[#allocation9 + $0xb0] sm:$0xff] }
  0x3b   :  { %984 = vmatmul.mubr.msk.f32.gmra.mxu0 %vm69_vm2, %v95_v25  ;;  %1030 = vmatprep.subr.mxu0 %v1297_v0  ;;  %v480_v57 = vld [vmem:[#allocation9 + $0x58] sm:$0xff]  ;;  %v479_v59 = vld [vmem:[#allocation9 + $0x50] sm:$0xff]  ;;  %v496_v60 = vld [vmem:[#allocation9 + $0xa8] sm:$0xff] }
  0x3c   :  { %1015 = vmatmul.mubr.msk.f32.gmra.mxu1 %vm69_vm2, %v82_v26  ;;  %1031 = vmatpush3.msra.mxu0 %v329_v27  ;;  %v478_v61 = vld [vmem:[#allocation9 + $0x48] sm:$0xff]  ;;  %v495_v62 = vld [vmem:[#allocation9 + $0xa0] sm:$0xff]  ;;  %v494_v1 = vld [vmem:[#allocation9 + $0x98] sm:$0xff] }
  0x3d   :  { %986 = vmatprep.mubr.msk.f32.mxu0 %vm1298_vm1, %v1297_v0  ;;  %1017 = vmatprep.mubr.msk.f32.mxu1 %vm1298_vm1, %v1297_v0  ;;  %v477_v63 = vld [vmem:[#allocation9 + $0x40] sm:$0xff]  ;;  %v476_v2 = vld [vmem:[#allocation9 + $0x38] sm:$0xff]  ;;  %v493_v3 = vld [vmem:[#allocation9 + $0x90] sm:$0xff] }
  0x3e   :  { %1032 = vmatprep.subr.mxu0 %v1297_v0  ;;  %1057 = vmatprep.subr.mxu1 %v1297_v0  ;;  %v475_v4 = vld [vmem:[#allocation9 + $0x30] sm:$0xff]  ;;  %v492_v5 = vld [vmem:[#allocation9 + $0x88] sm:$0xff]  ;;  %v491_v7 = vld [vmem:[#allocation9 + $0x80] sm:$0xff] }
  0x3f   :  { %987 = vmatmul.mubr.msk.f32.gmra.mxu0 %vm69_vm2, %v96_v28  ;;  %1058 = vmatpush3.msra.mxu1 %v506_v44  ;;  %v474_v6 = vld [vmem:[#allocation9 + $0x28] sm:$0xff]  ;;  %v473_v8 = vld [vmem:[#allocation9 + $0x20] sm:$0xff]  ;;  %v472_v9 = vld [vmem:[#allocation9 + $0x18] sm:$0xff] }
  0x40   :  { %1018 = vmatmul.mubr.msk.f32.gmra.mxu1 %vm69_vm2, %v83_v29  ;;  %1033 = vmatpush3.msra.mxu0 %v328_v30  ;;  %v471_v10 = vld [vmem:[#allocation9 + $0x10] sm:$0xff]  ;;  %v470_v11 = vld [vmem:[#allocation9 + $0x8] sm:$0xff]  ;;  %v469_v12 = vld [vmem:[#allocation9] sm:$0xff] }
  0x41   :  { %1034 = vmatprep.subr.mxu0 %v1297_v0  ;;  %989 = vmatprep.mubr.msk.f32.mxu0 %vm1298_vm1, %v1297_v0 }
  0x42   :  { %1035 = vmatpush3.msra.mxu0 %v327_v31  ;;  %1020 = vmatprep.mubr.msk.f32.mxu1 %vm1298_vm1, %v1297_v0 }
  0x43   :  { %990 = vmatmul.mubr.msk.f32.gmra.mxu0 %vm69_vm2, %v97_v32  ;;  %1036 = vmatprep.subr.mxu0 %v1297_v0 }
  0x44   :  { %1021 = vmatmul.mubr.msk.f32.gmra.mxu1 %vm69_vm2, %v84_v33  ;;  %1037 = vmatpush3.msra.mxu0 %v326_v34 }
  0x45   :  { %992 = vmatprep.mubr.msk.f32.mxu0 %vm1298_vm1, %v1297_v0  ;;  %1038 = vmatprep.subr.mxu0 %v1297_v0 }
  0x46   :  { %1023 = vmatprep.mubr.msk.f32.mxu1 %vm1298_vm1, %v1297_v0  ;;  %1039 = vmatpush3.msra.mxu0 %v325_v35  ;;  %v860_v35 = vld [vmem:[%s1521_s2] ss:$0 sm:$0xff] }
  0x47   :  { %993 = vmatmul.mubr.msk.f32.gmra.mxu0 %vm69_vm2, %v98_v36  ;;  %1040 = vmatprep.subr.mxu0 %v1297_v0 }
  0x48   :  { %1024 = vmatmul.mubr.msk.f32.gmra.mxu1 %vm69_vm2, %v85_v37  ;;  %1041 = vmatpush3.msra.mxu0 %v324_v38 }
  0x49   :  { %1042 = vmatprep.mubr.msk.f32.mxu0 %vm1298_vm1, %v1297_v0  ;;  %1104 = vmatprep.subr.mxu0 %v1297_v0 }
  0x4a   :  { %1089 = vmatprep.mubr.msk.f32.mxu1 %vm1298_vm1, %v1297_v0  ;;  %1059 = vmatprep.subr.mxu1 %v1297_v0 }
  0x4b   :  { %1043 = vmatmul.mubr.msk.f32.vlgmr.msra.gmra.mxu0 %vm69_vm2, %v318_v39  ;;  %1060 = vmatpush3.msra.mxu1 %v505_v45 }
  0x4c   :  { %1045 = vmatprep.mubr.msk.f32.mxu0 %vm1298_vm1, %v1297_v0  ;;  %1061 = vmatprep.subr.mxu1 %v1297_v0 }
  0x4d   :  { %1062 = vmatpush3.msra.mxu1 %v504_v46  ;;  %1105 = vmatpush3.msra.mxu0 %v484_v49 }
  0x4e   :  { %1063 = vmatprep.subr.mxu1 %v1297_v0  ;;  %1106 = vmatprep.subr.mxu0 %v1297_v0 }
  0x4f   :  { %1046 = vmatmul.mubr.msk.f32.gmra.mxu0 %vm69_vm2, %v319_v40  ;;  %1064 = vmatpush3.msra.mxu1 %v503_v47  ;;  %v707_v47 = vld [vmem:[#allocation9 + $0x170] sm:$0xff] }
  0x50   :  { %1048 = vmatprep.mubr.msk.f32.mxu0 %vm1298_vm1, %v1297_v0  ;;  %1065 = vmatprep.subr.mxu1 %v1297_v0 }
  0x51   :  { %1066 = vmatpush3.msra.mxu1 %v502_v48  ;;  %1107 = vmatpush3.msra.mxu0 %v483_v51  ;;  %v706_v51 = vld [vmem:[#allocation9 + $0x168] sm:$0xff] }
  0x52   :  { %1067 = vmatprep.subr.mxu1 %v1297_v0  ;;  %1108 = vmatprep.subr.mxu0 %v1297_v0 }
  0x53   :  { %1049 = vmatmul.mubr.msk.f32.gmra.mxu0 %vm69_vm2, %v320_v41  ;;  %1068 = vmatpush3.msra.mxu1 %v501_v50 }
  0x54   :  { %1051 = vmatprep.mubr.msk.f32.mxu0 %vm1298_vm1, %v1297_v0  ;;  %1069 = vmatprep.subr.mxu1 %v1297_v0 }
  0x55   :  { %1070 = vmatpush3.msra.mxu1 %v500_v52  ;;  %1109 = vmatpush3.msra.mxu0 %v482_v53 }
  0x56   :  { %1071 = vmatprep.subr.mxu1 %v1297_v0  ;;  %1110 = vmatprep.subr.mxu0 %v1297_v0 }
  0x57   :  { %1052 = vmatmul.mubr.msk.f32.gmra.mxu0 %vm69_vm2, %v321_v42  ;;  %1072 = vmatpush3.msra.mxu1 %v499_v54 }
  0x58   :  { %1054 = vmatprep.mubr.msk.f32.mxu0 %vm1298_vm1, %v1297_v0  ;;  %1111 = vmatpush3.msra.mxu0 %v481_v55  ;;  %v705_v55 = vld [vmem:[#allocation9 + $0x160] sm:$0xff] }
  0x59   :  { %1073 = vmatprep.subr.mxu1 %v1297_v0  ;;  %1112 = vmatprep.subr.mxu0 %v1297_v0 }
  0x5a   :  { %1074 = vmatpush3.msra.mxu1 %v498_v56  ;;  %1113 = vmatpush3.msra.mxu0 %v480_v57 }
  0x5b   :  { %1055 = vmatmul.mubr.msk.f32.gmra.mxu0 %vm69_vm2, %v322_v43  ;;  %1075 = vmatprep.subr.mxu1 %v1297_v0  ;;  %v708_v43 = vld [vmem:[#allocation9 + $0x178] sm:$0xff] }
  0x5c   :  { %1136 = vmatprep.mubr.msk.f32.mxu0 %vm1298_vm1, %v1297_v0  ;;  %1114 = vmatprep.subr.mxu0 %v1297_v0 }
  0x5d   :  { %1076 = vmatpush3.msra.mxu1 %v497_v58  ;;  %1115 = vmatpush3.msra.mxu0 %v479_v59  ;;  %v704_v59 = vld [vmem:[#allocation9 + $0x158] sm:$0xff] }
  0x5e   :  { %1077 = vmatprep.subr.mxu1 %v1297_v0  ;;  %1116 = vmatprep.subr.mxu0 %v1297_v0 }
  0x5f   :  { %1078 = vmatpush3.msra.mxu1 %v496_v60  ;;  %1117 = vmatpush3.msra.mxu0 %v478_v61 }
  0x60   :  { %1079 = vmatprep.subr.mxu1 %v1297_v0  ;;  %1118 = vmatprep.subr.mxu0 %v1297_v0 }
  0x61   :  { %1080 = vmatpush3.msra.mxu1 %v495_v62  ;;  %1119 = vmatpush3.msra.mxu0 %v477_v63 }
  0x62   :  { %1081 = vmatprep.subr.mxu1 %v1297_v0  ;;  %1120 = vmatprep.subr.mxu0 %v1297_v0 }
  0x63   :  { %1082 = vmatpush3.msra.mxu1 %v494_v1  ;;  %1121 = vmatpush3.msra.mxu0 %v476_v2  ;;  %v703_v1 = vld [vmem:[#allocation9 + $0x150] sm:$0xff] }
  0x64   :  { %1083 = vmatprep.subr.mxu1 %v1297_v0  ;;  %1122 = vmatprep.subr.mxu0 %v1297_v0 }
  0x65   :  { %1084 = vmatpush3.msra.mxu1 %v493_v3  ;;  %1123 = vmatpush3.msra.mxu0 %v475_v4 }
  0x66   :  { %1085 = vmatprep.subr.mxu1 %v1297_v0  ;;  %1124 = vmatprep.subr.mxu0 %v1297_v0 }
  0x67   :  { %1086 = vmatpush3.msra.mxu1 %v492_v5  ;;  %1125 = vmatpush3.msra.mxu0 %v474_v6  ;;  %v702_v5 = vld [vmem:[#allocation9 + $0x148] sm:$0xff] }
  0x68   :  { %1087 = vmatprep.subr.mxu1 %v1297_v0  ;;  %1126 = vmatprep.subr.mxu0 %v1297_v0 }
  0x69   :  { %1088 = vmatpush3.msra.mxu1 %v491_v7  ;;  %1127 = vmatpush3.msra.mxu0 %v473_v8 }
  0x6a   :  { %1151 = vmatprep.subr.mxu1 %v1297_v0  ;;  %1128 = vmatprep.subr.mxu0 %v1297_v0 }
  0x6b   :  { %1129 = vmatpush3.msra.mxu0 %v472_v9  ;;  %v701_v9 = vld [vmem:[#allocation9 + $0x140] sm:$0xff] }
  0x6c   :  { %1130 = vmatprep.subr.mxu0 %v1297_v0 }
  0x6d   :  { %1131 = vmatpush3.msra.mxu0 %v471_v10 }
  0x6e   :  { %1132 = vmatprep.subr.mxu0 %v1297_v0 }
  0x6f   :  { %1133 = vmatpush3.msra.mxu0 %v470_v11 }
  0x70   :  { %1134 = vmatprep.subr.mxu0 %v1297_v0 }
  0x71   :  { %1135 = vmatpush3.msra.mxu0 %v469_v12 }
  0xf7   :  { %v189_v13 = vpop.f32.mrf.mxu0 }
  0xf8   :  { %v294_v14 = vpop.f32.mrf.mxu1 }
  0xf9   :  { %v982_v15 = vpop.f32.mrf.mxu0  ;;  %v295_v32 = vadd.f32 %v294_v14, %v189_v13  ;;  %v700_v13 = vld [vmem:[#allocation9 + $0x138] sm:$0xff] }
  0xfa   :  { %v1013_v16 = vpop.f32.mrf.mxu1  ;;  %v699_v15 = vld [vmem:[#allocation9 + $0x130] sm:$0xff] }
  0xfb   :  { %v194_v17 = vpop.f32.mrf.mxu0 }
  0xfc   :  { %v299_v18 = vpop.f32.mrf.mxu1 }
  0xfd   :  { %v985_v19 = vpop.f32.mrf.mxu0  ;;  %v300_v38 = vadd.f32 %v299_v18, %v194_v17  ;;  %v698_v18 = vld [vmem:[#allocation9 + $0x128] sm:$0xff] }
  0xfe   :  { %v1016_v20 = vpop.f32.mrf.mxu1  ;;  %v697_v19 = vld [vmem:[#allocation9 + $0x120] sm:$0xff] }
  0xff   :  { %v199_v21 = vpop.f32.mrf.mxu0  ;;  %v696_v20 = vld [vmem:[#allocation9 + $0x118] sm:$0xff] }
 0x100   :  { %v304_v22 = vpop.f32.mrf.mxu1 }
 0x101   :  { %v988_v23 = vpop.f32.mrf.mxu0  ;;  %v305_v45 = vadd.f32 %v304_v22, %v199_v21  ;;  %v695_v21 = vld [vmem:[#allocation9 + $0x110] sm:$0xff]  ;;  %v694_v22 = vld [vmem:[#allocation9 + $0x108] sm:$0xff] }
 0x102   :  { %v1019_v24 = vpop.f32.mrf.mxu1  ;;  %v693_v23 = vld [vmem:[#allocation9 + $0x100] sm:$0xff] }
 0x103   :  { %v204_v25 = vpop.f32.mrf.mxu0 }
 0x104   :  { %v309_v26 = vpop.f32.mrf.mxu1 }
 0x105   :  { %v991_v27 = vpop.f32.mrf.mxu0  ;;  %v310_v53 = vadd.f32 %v309_v26, %v204_v25 }
 0x106   :  { %v1022_v28 = vpop.f32.mrf.mxu1 }
 0x107   :  { %v209_v29 = vpop.f32.mrf.mxu0 }
 0x108   :  { %v314_v30 = vpop.f32.mrf.mxu1 }
 0x109   :  { %v994_v31 = vpop.f32.mrf.mxu0  ;;  %v315_v62 = vadd.f32 %v314_v30, %v209_v29 }
 0x10a   :  { %v1025_v33 = vpop.f32.mrf.mxu1 }
 0x10b   :  { %v413_v34 = vpop.f32.mrf.mxu0 }
 0x10c   :  { %v437_v36 = vadd.f32 %v413_v34, %v295_v32 }
 0x10d   :  { %v1044_v37 = vpop.f32.mrf.mxu0 }
 0x10e   :  { %v449_v39 = vadd.f32 %v860_v35, %v437_v36 }
 0x10f   :  { %v418_v40 = vpop.f32.mrf.mxu0 }
 0x110   :  { %v454_v41 = vmax.f32 %v449_v39, 0.0  ;;  %v438_v42 = vadd.f32 %v418_v40, %v300_v38 }
 0x111   :  { %v1047_v44 = vpop.f32.mrf.mxu0 }
 0x112   :  { %459 = vst [vmem:[#allocation3 + $0x1] sm:$0xff] %v454_v41  ;;  %v450_v46 = vadd.f32 %v860_v35, %v438_v42  ;;  %1090 = vmatmul.mubr.f32.vlgmr.msra.gmra.mxu1 %v454_v41 }
 0x113   :  { %v423_v48 = vpop.f32.mrf.mxu0  ;;  %1152 = vmatpush3.msra.mxu1 %v708_v43  ;;  %1092 = vmatprep.mubr.msk.f32.mxu1 %vm1298_vm1, %v1297_v0 }
 0x114   :  { %v455_v49 = vmax.f32 %v450_v46, 0.0  ;;  %v439_v50 = vadd.f32 %v423_v48, %v305_v45  ;;  %1153 = vmatprep.subr.mxu1 %v1297_v0 }
 0x115   :  { %v1050_v52 = vpop.f32.mrf.mxu0  ;;  %1154 = vmatpush3.msra.mxu1 %v707_v47 }
 0x116   :  { %460 = vst [vmem:[#allocation3 + $0x9] sm:$0xff] %v455_v49  ;;  %v451_v54 = vadd.f32 %v860_v35, %v439_v50  ;;  %1155 = vmatprep.subr.mxu1 %v1297_v0  ;;  %1093 = vmatmul.mubr.f32.gmra.mxu1 %v455_v49  ;;  %v861_v50 = vld [vmem:[%s1523_s4] ss:$0 sm:$0xff]  ;;  %s1299_s4 = smov [#allocation10]  }
 0x117   :  { %v428_v56 = vpop.f32.mrf.mxu0  ;;  %1156 = vmatpush3.msra.mxu1 %v706_v51  ;;  %1095 = vmatprep.mubr.msk.f32.mxu1 %vm1298_vm1, %v1297_v0  ;;  %s832_s10 = sshll.u32 %s1299_s4, 4  ;;  %s833_s10 = int_to_ptr.vmem [resolvable:$true] %s832_s10 }
 0x118   :  { %v456_v57 = vmax.f32 %v451_v54, 0.0  ;;  %v440_v58 = vadd.f32 %v428_v56, %v310_v53  ;;  %1157 = vmatprep.subr.mxu1 %v1297_v0  ;;  %s1266_s11 = scalar_lea.vmem %s833_s10, 512  ;;  %p1271_p2 = scmp.lt.s32.totalorder %s833_s10, %s833_s10 }
 0x119   :  { %v1053_v60 = vpop.f32.mrf.mxu0  ;;  %v464_v61 = vld [vmem:[#allocation3] sm:$0xff]  ;;  %1158 = vmatpush3.msra.mxu1 %v705_v55  ;;  %p1267_p1 = scmp.ne.s32.totalorder %s833_s10, %s1266_s11  ;;  %p1272_p3 = scmp.lt.s32.totalorder %s1266_s11, %s1266_s11 }
 0x11a   :  { %461 = vst [vmem:[#allocation3 + $0x11] sm:$0xfc] %v456_v57  ;;  %v452_v63 = vadd.f32 %v860_v35, %v440_v58  ;;  %1137 = vmatmul.mubr.f32.vlgmr.msra.gmra.mxu0 %v464_v61  ;;  %1159 = vmatprep.subr.mxu1 %v1297_v0 }
 0x11b   :  { %v433_v2 = vpop.f32.mrf.mxu0  ;;  %1139 = vmatprep.mubr.msk.f32.mxu0 %vm1298_vm1, %v1297_v0  ;;  %1160 = vmatpush3.msra.mxu1 %v704_v59  ;;  %p1273_p4 = por %p1272_p3, %p1271_p2 }
 0x11c   :  { %v457_v3 = vmax.f32 %v452_v63, 0.0  ;;  %v441_v4 = vadd.f32 %v433_v2, %v315_v62  ;;  %1161 = vmatprep.subr.mxu1 %v1297_v0 }
 0x11d   :  { %v465_v6 = vld [vmem:[#allocation3 + $0x8] sm:$0xff]  ;;  %1162 = vmatpush3.msra.mxu1 %v703_v1  ;;  %v1056_v7 = vpop.f32.mrf.mxu0  ;;  %p1274_p5 = pnand %p1273_p4, %p1267_p1 }
 0x11e   :  { %462 = vst [vmem:[#allocation3 + $0x19] sm:$0xff] %v457_v3  ;;  %v453_v8 = vadd.f32 %v860_v35, %v441_v4  ;;  %1140 = vmatmul.mubr.f32.gmra.mxu0 %v465_v6  ;;  %1163 = vmatprep.subr.mxu1 %v1297_v0  ;;  %v687_v24 = vld [vmem:[#allocation3 + $0x2] sm:$0xff]  ;;  %v688_v25 = vld [vmem:[#allocation3 + $0xa] sm:$0xff] }
 0x11f   :  { %1142 = vmatprep.mubr.msk.f32.mxu0 %vm1298_vm1, %v1297_v0  ;;  %1164 = vmatpush3.msra.mxu1 %v702_v5 }
 0x120   :  { %v458_v10 = vmax.f32 %v453_v8, 0.0  ;;  %1165 = vmatprep.subr.mxu1 %v1297_v0 }
 0x121   :  { %v487_v11 = vld [vmem:[#allocation3 + $0x11] sm:$0xff]  ;;  %1166 = vmatpush3.msra.mxu1 %v701_v9 }
 0x122   :  { %v466_v12 = vld [vmem:[#allocation3 + $0x10] sm:$0xff]  ;;  %463 = vst [vmem:[#allocation3 + $0x21] sm:$0x3] %v458_v10  ;;  %1096 = vmatmul.mubr.f32.gmra.mxu1 %v487_v11  ;;  %1167 = vmatprep.subr.mxu1 %v1297_v0 }
 0x123   :  { %1143 = vmatmul.mubr.f32.gmra.mxu0 %v466_v12  ;;  %1098 = vmatprep.mubr.msk.f32.mxu1 %vm1298_vm1, %v1297_v0 }
 0x124   :  { %1145 = vmatprep.mubr.msk.f32.mxu0 %vm1298_vm1, %v1297_v0  ;;  %1168 = vmatpush3.msra.mxu1 %v700_v13 }
 0x125   :  { %v467_v14 = vld [vmem:[#allocation3 + $0x18] sm:$0xff]  ;;  %1169 = vmatprep.subr.mxu1 %v1297_v0 }
 0x126   :  { %1099 = vmatmul.mubr.f32.gmra.mxu1 %v457_v3  ;;  %v689_v26 = vld [vmem:[#allocation3 + $0x12] sm:$0xff] }
 0x127   :  { %1146 = vmatmul.mubr.f32.gmra.mxu0 %v467_v14  ;;  %1101 = vmatprep.mubr.msk.f32.mxu1 %vm1298_vm1, %v1297_v0 }
 0x128   :  { %1148 = vmatprep.mubr.msk.f32.mxu0 %vm1298_vm1, %v1297_v0  ;;  %1170 = vmatpush3.msra.mxu1 %v699_v15 }
 0x129   :  { %v489_v16 = vld [vmem:[#allocation3 + $0x21] sm:$0x3]  ;;  %1171 = vmatprep.subr.mxu1 %v1297_v0 }
 0x12a   :  { %v468_v17 = vld [vmem:[#allocation3 + $0x20] sm:$0x3]  ;;  %1102 = vmatmul.mubr.f32.gmra.mxu1 %v489_v16  ;;  %v691_v28 = vld [vmem:[#allocation3 + $0x22] sm:$0x3] }
 0x12b   :  { %1149 = vmatmul.mubr.f32.gmra.mxu0 %v468_v17  ;;  %1183 = vmatprep.mubr.msk.f32.mxu1 %vm1298_vm1, %v1297_v0  ;;  %v690_v27 = vld [vmem:[#allocation3 + $0x1a] sm:$0xff] }
 0x12c   :  { %1172 = vmatpush3.msra.mxu1 %v698_v18 }
 0x12d   :  { %1173 = vmatprep.subr.mxu1 %v1297_v0 }
 0x12e   :  { %1174 = vmatpush3.msra.mxu1 %v697_v19 }
 0x12f   :  { %1175 = vmatprep.subr.mxu1 %v1297_v0 }
 0x130   :  { %1176 = vmatpush3.msra.mxu1 %v696_v20 }
 0x131   :  { %1177 = vmatprep.subr.mxu1 %v1297_v0 }
 0x132   :  { %1178 = vmatpush3.msra.mxu1 %v695_v21 }
 0x133   :  { %1179 = vmatprep.subr.mxu1 %v1297_v0 }
 0x134   :  { %1180 = vmatpush3.msra.mxu1 %v694_v22 }
 0x135   :  { %1181 = vmatprep.subr.mxu1 %v1297_v0 }
 0x136   :  { %1182 = vmatpush3.msra.mxu1 %v693_v23 }
 0x137   :  { %1184 = vmatmul.mubr.f32.vlgmr.msra.gmra.mxu1 %v687_v24 }
 0x138   :  { %1186 = vmatprep.mubr.msk.f32.mxu1 %vm1298_vm1, %v1297_v0 }
 0x13b   :  { %1187 = vmatmul.mubr.f32.gmra.mxu1 %v688_v25 }
 0x13c   :  { %1189 = vmatprep.mubr.msk.f32.mxu1 %vm1298_vm1, %v1297_v0 }
 0x13f   :  { %1190 = vmatmul.mubr.f32.gmra.mxu1 %v689_v26 }
 0x140   :  { %1192 = vmatprep.mubr.msk.f32.mxu1 %vm1298_vm1, %v1297_v0 }
 0x143   :  { %1193 = vmatmul.mubr.f32.gmra.mxu1 %v690_v27 }
 0x144   :  { %1195 = vmatprep.mubr.msk.f32.mxu1 %vm1298_vm1, %v1297_v0 }
 0x147   :  { %1196 = vmatmul.mubr.f32.gmra.mxu1 %v691_v28 }
 0x1d2   :  { %v573_v29 = vpop.f32.mrf.mxu1 }
 0x1d4   :  { %v1091_v30 = vpop.f32.mrf.mxu1 }
 0x1d6   :  { %v578_v31 = vpop.f32.mrf.mxu1 }
 0x1d8   :  { %v1094_v32 = vpop.f32.mrf.mxu1 }
 0x1da   :  { %v663_v33 = vpop.f32.mrf.mxu0 }
 0x1db   :  { %v664_v48 = vadd.f32 %v663_v33, %v573_v29 }
 0x1dc   :  { %v1138_v34 = vpop.f32.mrf.mxu0 }
 0x1de   :  { %v668_v35 = vpop.f32.mrf.mxu0 }
 0x1df   :  { %v669_v53 = vadd.f32 %v668_v35, %v578_v31 }
 0x1e0   :  { %v1141_v36 = vpop.f32.mrf.mxu0 }
 0x1e2   :  { %v583_v37 = vpop.f32.mrf.mxu1 }
 0x1e3   :  { %v673_v38 = vpop.f32.mrf.mxu0 }
 0x1e4   :  { %v1097_v39 = vpop.f32.mrf.mxu1  ;;  %v674_v59 = vadd.f32 %v673_v38, %v583_v37 }
 0x1e5   :  { %v1144_v40 = vpop.f32.mrf.mxu0 }
 0x1e6   :  { %v588_v41 = vpop.f32.mrf.mxu1 }
 0x1e7   :  { %v678_v42 = vpop.f32.mrf.mxu0 }
 0x1e8   :  { %v1100_v43 = vpop.f32.mrf.mxu1  ;;  %v679_v2 = vadd.f32 %v678_v42, %v588_v41 }
 0x1e9   :  { %v1147_v44 = vpop.f32.mrf.mxu0 }
 0x1ea   :  { %v593_v45 = vpop.f32.mrf.mxu1 }
 0x1eb   :  { %v683_v0 = vpop.f32.mrf.mxu0 }
 0x1ec   :  { %v1103_v46 = vpop.f32.mrf.mxu1  ;;  %v684_v8 = vadd.f32 %v683_v0, %v593_v45 }
 0x1ed   :  { %v1150_v47 = vpop.f32.mrf.mxu0 }
 0x1f7   :  { %v775_v49 = vpop.f32.mrf.mxu1 }
 0x1f8   :  { %v799_v51 = vadd.f32 %v775_v49, %v664_v48 }
 0x1f9   :  { %v1185_v52 = vpop.f32.mrf.mxu1 }
 0x1fa   :  { %v811_v54 = vadd.f32 %v861_v50, %v799_v51 }
 0x1fb   :  { %v780_v55 = vpop.f32.mrf.mxu1 }
 0x1fc   :  { %v816_v56 = vmax.f32 %v811_v54, 0.0  ;;  %v800_v57 = vadd.f32 %v780_v55, %v669_v53 }
 0x1fd   :  { %v1188_v58 = vpop.f32.mrf.mxu1 }
 0x1fe   :  { %821 = vst [vmem:[#allocation10] sm:$0xff] %v816_v56  ;;  %v812_v60 = vadd.f32 %v861_v50, %v800_v57 }
 0x1ff   :  { %v785_v61 = vpop.f32.mrf.mxu1 }
 0x200   :  { %v817_v62 = vmax.f32 %v812_v60, 0.0  ;;  %v801_v63 = vadd.f32 %v785_v61, %v674_v59 }
 0x201   :  { %v1191_v1 = vpop.f32.mrf.mxu1 }
 0x202   :  { %822 = vst [vmem:[#allocation10 + $0x8] sm:$0xff] %v817_v62  ;;  %v813_v3 = vadd.f32 %v861_v50, %v801_v63 }
 0x203   :  { %v790_v4 = vpop.f32.mrf.mxu1 }
 0x204   :  { %v818_v5 = vmax.f32 %v813_v3, 0.0  ;;  %v802_v6 = vadd.f32 %v790_v4, %v679_v2 }
 0x205   :  { %v1194_v7 = vpop.f32.mrf.mxu1 }
 0x206   :  { %824 = vst [vmem:[#allocation10 + $0xe] sm:$0xfc] %v818_v5  ;;  %v814_v9 = vadd.f32 %v861_v50, %v802_v6 }
 0x207   :  { %v795_v10 = vpop.f32.mrf.mxu1 }
 0x208   :  { %v819_v11 = vmax.f32 %v814_v9, 0.0  ;;  %v803_v12 = vadd.f32 %v795_v10, %v684_v8 }
 0x209   :  { %v1197_v13 = vpop.f32.mrf.mxu1 }
 0x20a   :  { %825 = vst [vmem:[#allocation10 + $0x16] sm:$0xff] %v819_v11  ;;  %v815_v14 = vadd.f32 %v861_v50, %v803_v12 }
 0x20c   :  { %v820_v15 = vmax.f32 %v815_v14, 0.0 }
 0x20e   :  { %826 = vst [vmem:[#allocation10 + $0x1e] sm:$0x3] %v820_v15 }
 0x20f   :  { %1277 = shalt.err (!%p1274_p5)
}
 0x210   :  { %838 = dma.vmem_to_hbm [thread:$0]  %s833_s10, 512, %s1524_s5, [#allocation6], %s1294_s23, %s1294_s23, %s1295_s24  }
 0x211   :  { %1290 = dma.done.wait [#allocation6], 512  }
 0x212   :  { %1291 = vsyncadd [#allocation6], 4294966784 }
 0x213   :  { %842 = vsyncpa [#allocation5], 1 }
 0x214   :  { %843 = vsyncpa [#allocation8], 1 }
 0x215   :  { %844 = vsyncpa [#allocation6], 1 }

</bundles_post_ra>
